<compile_context>
chip_gen: v7x
topology: tpu7x:2x2x1
jax: 0.10.0
libtpu: 0.0.40
codegen_flags: <defaults>
</compile_context>

<pallas_src>
import functools

import jax
import jax.numpy as jnp
from jax.experimental import pallas as pl
from jax.experimental.pallas import tpu as pltpu

HIDDEN = 384        # 3 * 128, lane-aligned (model-fixed)
LANES = 128
MAX_TILE_B = 1024   # upper bound on the batch tile (grid = 1 for batch <= 1024)


def _round_up(n, m):
    return ((n + m - 1) // m) * m


def _supports_bf16_elementwise():
    """bf16 VPU/EUP exists on v6e/v7x; v5e (and unknown chips) use the f32 path."""
    try:
        kind = jax.devices()[0].device_kind.lower()
    except Exception:
        return False
    return ("v6" in kind) or ("v7" in kind)


def actor_kernel(ma_ref, x_ref, w1_ref, b1_ref, w2_ref, b2_ref,
                 w3_ref, b3_ref, o_ref, *, bf16_tail):
    max_a = ma_ref[0, 0]                                   # SMEM scalar
    # Elementwise tail dtype: bf16 on v6e/v7x, f32 on v5e (no bf16 VPU/EUP).
    acc_dt = jnp.bfloat16 if bf16_tail else jnp.float32

    # layer 1: (TB, S) @ (S, H); MXU accumulates f32 internally either way.
    h = jnp.dot(x_ref[...], w1_ref[...], preferred_element_type=acc_dt)
    h = jnp.maximum(h + b1_ref[...], 0.0)
    if not bf16_tail:
        h = h.astype(jnp.bfloat16)                          # back to MXU dtype

    # layer 2: (TB, H) @ (H, H)
    h = jnp.dot(h, w2_ref[...], preferred_element_type=acc_dt)
    h = jnp.maximum(h + b2_ref[...], 0.0)
    if not bf16_tail:
        h = h.astype(jnp.bfloat16)

    # layer 3: (TB, H) @ (H, A_pad); accumulate + tanh + scale in f32.
    h = jnp.dot(h, w3_ref[...], preferred_element_type=jnp.float32)
    o_ref[...] = jnp.tanh(h + b3_ref[...]) * max_a


@functools.partial(jax.jit, static_argnames=("tile_b", "bf16_tail"))
def actor_forward(x, params, max_action, *, tile_b=MAX_TILE_B, bf16_tail=None):
    if bf16_tail is None:
        bf16_tail = _supports_bf16_elementwise()

    w1, b1, w2, b2, w3, b3 = params
    batch, state_size = x.shape
    action_size = w3.shape[1]

    # bf16 operands for the MXU.
    x_bf = x.astype(jnp.bfloat16)
    w1_bf = w1.astype(jnp.bfloat16)
    w2_bf = w2.astype(jnp.bfloat16)
    bias_dt = jnp.bfloat16 if bf16_tail else jnp.float32
    b1c = b1.astype(bias_dt)
    b2c = b2.astype(bias_dt)

    # Lane-dense (128-padded) layer-3 output; sliced back in the wrapper.
    out_lanes = _round_up(max(action_size, 1), LANES)
    w3_bf = jnp.pad(w3, ((0, 0), (0, out_lanes - action_size))).astype(jnp.bfloat16)
    b3f = jnp.pad(b3.astype(jnp.float32), ((0, 0), (0, out_lanes - action_size)))

    # One big batch tile (grid collapses to 1 step for batch <= tile_b).
    # Round to 16 rows: bf16 packs two rows per sublane.
    tile = min(_round_up(batch, 16), tile_b)
    padded_b = _round_up(batch, tile)
    if padded_b != batch:
        x_bf = jnp.pad(x_bf, ((0, padded_b - batch), (0, 0)))

    ma = jnp.full((1, 1), max_action, jnp.float32)          # runtime SMEM scalar

    grid = (padded_b // tile,)
    # Only split across cores ("parallel") when there are >= 2 full tiles;
    # a single latency-bound step is better left on one TensorCore.
    semantics = ("parallel",) if grid[0] > 1 else ("arbitrary",)

    out = pl.pallas_call(
        functools.partial(actor_kernel, bf16_tail=bf16_tail),
        out_shape=jax.ShapeDtypeStruct((padded_b, out_lanes), jnp.float32),
        grid=grid,
        in_specs=[
            pl.BlockSpec((1, 1), lambda i: (0, 0),
                         memory_space=pltpu.MemorySpace.SMEM),      # max_action
            pl.BlockSpec((tile, state_size), lambda i: (i, 0)),     # x tile
            pl.BlockSpec((state_size, HIDDEN), lambda i: (0, 0)),   # w1 (resident)
            pl.BlockSpec((1, HIDDEN), lambda i: (0, 0)),            # b1
            pl.BlockSpec((HIDDEN, HIDDEN), lambda i: (0, 0)),       # w2
            pl.BlockSpec((1, HIDDEN), lambda i: (0, 0)),            # b2
            pl.BlockSpec((HIDDEN, out_lanes), lambda i: (0, 0)),    # w3 (padded)
            pl.BlockSpec((1, out_lanes), lambda i: (0, 0)),         # b3 (padded)
        ],
        out_specs=pl.BlockSpec((tile, out_lanes), lambda i: (i, 0)),
        compiler_params=pltpu.CompilerParams(dimension_semantics=semantics),
    )(ma, x_bf, w1_bf, b1c, w2_bf, b2c, w3_bf, b3f)

    return out[:batch, :action_size]


def init_params(key, state_size, action_size):
    """Deterministic init mimicking nn.Linear default (uniform +/- 1/sqrt(fan_in)).
    Weights are stored as (in_features, out_features)."""
    ks = jax.random.split(key, 6)

    def linear(kw, kb, fan_in, fan_out):
        bound = 1.0 / jnp.sqrt(jnp.float32(fan_in))
        w = jax.random.uniform(kw, (fan_in, fan_out), jnp.float32, -bound, bound)
        b = jax.random.uniform(kb, (1, fan_out), jnp.float32, -bound, bound)
        return w, b

    w1, b1 = linear(ks[0], ks[1], state_size, HIDDEN)
    w2, b2 = linear(ks[2], ks[3], HIDDEN, HIDDEN)
    w3, b3 = linear(ks[4], ks[5], HIDDEN, action_size)
    return (w1, b1, w2, b2, w3, b3)


def _ref_kernel_dtypes(x, params, max_action, bf16_tail):
    """Pure-JAX reference that mirrors the kernel's dtype choices exactly."""
    w1, b1, w2, b2, w3, b3 = params
    acc_dt = jnp.bfloat16 if bf16_tail else jnp.float32
    bias_dt = jnp.bfloat16 if bf16_tail else jnp.float32

    h = jnp.dot(x.astype(jnp.bfloat16), w1.astype(jnp.bfloat16),
                preferred_element_type=acc_dt)
    h = jnp.maximum(h + b1.astype(bias_dt), 0.0)
    if not bf16_tail:
        h = h.astype(jnp.bfloat16)
    h = jnp.dot(h, w2.astype(jnp.bfloat16), preferred_element_type=acc_dt)
    h = jnp.maximum(h + b2.astype(bias_dt), 0.0)
    if not bf16_tail:
        h = h.astype(jnp.bfloat16)
    h = jnp.dot(h, w3.astype(jnp.bfloat16), preferred_element_type=jnp.float32)
    return jnp.tanh(h + b3.astype(jnp.float32)) * max_action


def _ref_f32(x, params, max_action):
    """Full-f32 PyTorch-equivalent forward."""
    w1, b1, w2, b2, w3, b3 = params
    h = jnp.maximum(x @ w1 + b1, 0.0)
    h = jnp.maximum(h @ w2 + b2, 0.0)
    return jnp.tanh(h @ w3 + b3) * max_action


if __name__ == "__main__":
    key = jax.random.PRNGKey(0)
    k_param, k_x = jax.random.split(key)

    batch = 256        # multiple env steps batched -> still a single grid step
    state_size = 32    # e.g. proprioceptive observation dim
    action_size = 3    # e.g. boxhead walker action dim
    max_action = 1.0   # env.action_spec()[0].maximum[0] for dm_soccer boxhead

    params = init_params(k_param, state_size, action_size)
    x = jax.random.normal(k_x, (batch, state_size), jnp.float32)

    bf16_tail = _supports_bf16_elementwise()
    out = actor_forward(x, params, max_action, bf16_tail=bf16_tail)
    jax.block_until_ready(out)
    assert out.shape == (batch, action_size)

    # Check against a reference that mirrors the kernel's exact dtype choices.
    ref_dt = _ref_kernel_dtypes(x, params, max_action, bf16_tail)
    assert jnp.allclose(out, ref_dt, atol=1e-2, rtol=1e-2), (
        float(jnp.max(jnp.abs(out - ref_dt))))

    # Loose sanity check against the full-f32 PyTorch-equivalent forward
    # (bf16 MXU operands discard input mantissa -> generous tolerance).
    ref32 = _ref_f32(x, params, max_action)
    assert jnp.allclose(out, ref32, atol=8e-2, rtol=8e-2), (
        float(jnp.max(jnp.abs(out - ref32))))

    print("KERNEL_OK")
</pallas_src>

<mosaic_0001>
module attributes {stable_mosaic.version = 11 : i64} {
  func.func @actor_kernel(%arg0: i32, %arg1: memref<1x1xf32, #tpu.memory_space<smem>>, %arg2: memref<256x32xbf16, #tpu.memory_space<vmem>>, %arg3: memref<32x384xbf16, #tpu.memory_space<vmem>>, %arg4: memref<1x384xf32, #tpu.memory_space<vmem>>, %arg5: memref<384x384xbf16, #tpu.memory_space<vmem>>, %arg6: memref<1x384xf32, #tpu.memory_space<vmem>>, %arg7: memref<384x128xbf16, #tpu.memory_space<vmem>>, %arg8: memref<1x128xf32, #tpu.memory_space<vmem>>, %arg9: memref<256x128xf32, #tpu.memory_space<vmem>>) attributes {dimension_semantics = [#tpu.dimension_semantics<arbitrary>], iteration_bounds = array<i64: 1>, scalar_prefetch = 0 : i64, scratch_operands = 0 : i64, tpu.core_type = #tpu.core_type<tc>, window_params = [{transform_indices = @transform_0, window_bounds = array<i64: 1, 1>}, {transform_indices = @transform_1, window_bounds = array<i64: 256, 32>}, {pipeline_mode = #tpu.pipeline_mode<synchronous>, transform_indices = @transform_2, window_bounds = array<i64: 32, 384>}, {pipeline_mode = #tpu.pipeline_mode<synchronous>, transform_indices = @transform_3, window_bounds = array<i64: 1, 384>}, {pipeline_mode = #tpu.pipeline_mode<synchronous>, transform_indices = @transform_4, window_bounds = array<i64: 384, 384>}, {pipeline_mode = #tpu.pipeline_mode<synchronous>, transform_indices = @transform_5, window_bounds = array<i64: 1, 384>}, {pipeline_mode = #tpu.pipeline_mode<synchronous>, transform_indices = @transform_6, window_bounds = array<i64: 384, 128>}, {pipeline_mode = #tpu.pipeline_mode<synchronous>, transform_indices = @transform_7, window_bounds = array<i64: 1, 128>}, {transform_indices = @transform_8, window_bounds = array<i64: 256, 128>}]} {
    %c0 = arith.constant 0 : index
    %c0_0 = arith.constant 0 : index
    %0 = memref.load %arg1[%c0, %c0_0] : memref<1x1xf32, #tpu.memory_space<smem>>
    %c0_1 = arith.constant 0 : index
    %c0_2 = arith.constant 0 : index
    %1 = vector.load %arg2[%c0_1, %c0_2] : memref<256x32xbf16, #tpu.memory_space<vmem>>, vector<256x32xbf16>
    %c0_3 = arith.constant 0 : index
    %c0_4 = arith.constant 0 : index
    %2 = vector.load %arg3[%c0_3, %c0_4] : memref<32x384xbf16, #tpu.memory_space<vmem>>, vector<32x384xbf16>
    %cst = arith.constant dense<0.000000e+00> : vector<256x384xf32>
    %3 = tpu.matmul %1, %2, %cst {dimension_numbers = #tpu.dot_dimension_numbers<[1], [0], [0], [1], [0, 0, 1, 1], [], []>} : vector<256x32xbf16>, vector<32x384xbf16>, vector<256x384xf32> -> vector<256x384xf32>
    %c0_5 = arith.constant 0 : index
    %c0_6 = arith.constant 0 : index
    %4 = vector.load %arg4[%c0_5, %c0_6] : memref<1x384xf32, #tpu.memory_space<vmem>>, vector<1x384xf32>
    %5 = vector.broadcast %4 : vector<1x384xf32> to vector<256x384xf32>
    %6 = arith.addf %3, %5 : vector<256x384xf32>
    %cst_7 = arith.constant 0.000000e+00 : f32
    %7 = vector.broadcast %cst_7 : f32 to vector<256x384xf32>
    %8 = arith.maximumf %6, %7 : vector<256x384xf32>
    %9 = arith.truncf %8 : vector<256x384xf32> to vector<256x384xbf16>
    %c0_8 = arith.constant 0 : index
    %c0_9 = arith.constant 0 : index
    %10 = vector.load %arg5[%c0_8, %c0_9] : memref<384x384xbf16, #tpu.memory_space<vmem>>, vector<384x384xbf16>
    %cst_10 = arith.constant dense<0.000000e+00> : vector<256x384xf32>
    %11 = tpu.matmul %9, %10, %cst_10 {dimension_numbers = #tpu.dot_dimension_numbers<[1], [0], [0], [1], [0, 0, 1, 1], [], []>} : vector<256x384xbf16>, vector<384x384xbf16>, vector<256x384xf32> -> vector<256x384xf32>
    %c0_11 = arith.constant 0 : index
    %c0_12 = arith.constant 0 : index
    %12 = vector.load %arg6[%c0_11, %c0_12] : memref<1x384xf32, #tpu.memory_space<vmem>>, vector<1x384xf32>
    %13 = vector.broadcast %12 : vector<1x384xf32> to vector<256x384xf32>
    %14 = arith.addf %11, %13 : vector<256x384xf32>
    %cst_13 = arith.constant 0.000000e+00 : f32
    %15 = vector.broadcast %cst_13 : f32 to vector<256x384xf32>
    %16 = arith.maximumf %14, %15 : vector<256x384xf32>
    %17 = arith.truncf %16 : vector<256x384xf32> to vector<256x384xbf16>
    %c0_14 = arith.constant 0 : index
    %c0_15 = arith.constant 0 : index
    %18 = vector.load %arg7[%c0_14, %c0_15] : memref<384x128xbf16, #tpu.memory_space<vmem>>, vector<384x128xbf16>
    %cst_16 = arith.constant dense<0.000000e+00> : vector<256x128xf32>
    %19 = tpu.matmul %17, %18, %cst_16 {dimension_numbers = #tpu.dot_dimension_numbers<[1], [0], [0], [1], [0, 0, 1, 1], [], []>} : vector<256x384xbf16>, vector<384x128xbf16>, vector<256x128xf32> -> vector<256x128xf32>
    %c0_17 = arith.constant 0 : index
    %c0_18 = arith.constant 0 : index
    %20 = vector.load %arg8[%c0_17, %c0_18] : memref<1x128xf32, #tpu.memory_space<vmem>>, vector<1x128xf32>
    %21 = vector.broadcast %20 : vector<1x128xf32> to vector<256x128xf32>
    %22 = arith.addf %19, %21 : vector<256x128xf32>
    %23 = math.tanh %22 : vector<256x128xf32>
    %24 = vector.broadcast %0 : f32 to vector<256x128xf32>
    %25 = arith.mulf %23, %24 : vector<256x128xf32>
    %c0_19 = arith.constant 0 : index
    %c0_20 = arith.constant 0 : index
    %26 = vector.load %arg9[%c0_19, %c0_20] : memref<256x128xf32, #tpu.memory_space<vmem>>, vector<256x128xf32>
    tpu.vector_store %arg9[%c0_19, %c0_20], %25 {strides = array<i32>} : memref<256x128xf32, #tpu.memory_space<vmem>>, vector<256x128xf32>,
    return
  }
  func.func @transform_0(%arg0: i32) -> (i32, i32) {
    %c0_i32 = arith.constant 0 : i32
    %c0_i32_0 = arith.constant 0 : i32
    %c0_i32_1 = arith.constant 0 : i32
    return %c0_i32, %c0_i32_0 : i32, i32
  }
  func.func @transform_1(%arg0: i32) -> (i32, i32) {
    %c0_i32 = arith.constant 0 : i32
    %c0_i32_0 = arith.constant 0 : i32
    return %arg0, %c0_i32 : i32, i32
  }
  func.func @transform_2(%arg0: i32) -> (i32, i32) {
    %c0_i32 = arith.constant 0 : i32
    %c0_i32_0 = arith.constant 0 : i32
    %c0_i32_1 = arith.constant 0 : i32
    return %c0_i32, %c0_i32_0 : i32, i32
  }
  func.func @transform_3(%arg0: i32) -> (i32, i32) {
    %c0_i32 = arith.constant 0 : i32
    %c0_i32_0 = arith.constant 0 : i32
    %c0_i32_1 = arith.constant 0 : i32
    return %c0_i32, %c0_i32_0 : i32, i32
  }
  func.func @transform_4(%arg0: i32) -> (i32, i32) {
    %c0_i32 = arith.constant 0 : i32
    %c0_i32_0 = arith.constant 0 : i32
    %c0_i32_1 = arith.constant 0 : i32
    return %c0_i32, %c0_i32_0 : i32, i32
  }
  func.func @transform_5(%arg0: i32) -> (i32, i32) {
    %c0_i32 = arith.constant 0 : i32
    %c0_i32_0 = arith.constant 0 : i32
    %c0_i32_1 = arith.constant 0 : i32
    return %c0_i32, %c0_i32_0 : i32, i32
  }
  func.func @transform_6(%arg0: i32) -> (i32, i32) {
    %c0_i32 = arith.constant 0 : i32
    %c0_i32_0 = arith.constant 0 : i32
    %c0_i32_1 = arith.constant 0 : i32
    return %c0_i32, %c0_i32_0 : i32, i32
  }
  func.func @transform_7(%arg0: i32) -> (i32, i32) {
    %c0_i32 = arith.constant 0 : i32
    %c0_i32_0 = arith.constant 0 : i32
    %c0_i32_1 = arith.constant 0 : i32
    return %c0_i32, %c0_i32_0 : i32, i32
  }
  func.func @transform_8(%arg0: i32) -> (i32, i32) {
    %c0_i32 = arith.constant 0 : i32
    %c0_i32_0 = arith.constant 0 : i32
    return %arg0, %c0_i32 : i32, i32
  }
}

</mosaic_0001>

<bundles_post_ra>
// kernel: actor_forward.1
= control target key start
LH: loop header
LB: loop body
LE: loop exit
PB: predicated region body
PF: predicated region fallthrough
CT: control target
= control target key end

     0   :  { %v3633_v1 = vmov 0   ;;  %vm201_vm0 = vcmask 261120   ;;  %s4773_s2 = inlined_call_operand.vmem [shape: bf16[32,384], index: 2, kind: input, shape index: {}]   ;;  %s4774_s1 = inlined_call_operand.vmem [shape: bf16[256,32], index: 1, kind: input, shape index: {}]   ;;  %s4775_s4 = inlined_call_operand.vmem [shape: bf16[384,384], index: 4, kind: input, shape index: {}]   ;;  %s4776_s3 = inlined_call_operand.vmem [shape: f32[1,384], index: 3, kind: input, shape index: {}]   ;;  %s4777_s6 = inlined_call_operand.vmem [shape: bf16[384,128], index: 6, kind: input, shape index: {}]   ;;  %s4778_s5 = inlined_call_operand.vmem [shape: f32[1,384], index: 5, kind: input, shape index: {}]   ;;  %s4779_s7 = inlined_call_operand.vmem [shape: f32[1,128], index: 7, kind: input, shape index: {}]   ;;  %s4780_s0 = inlined_call_operand.<no memory space> [shape: f32[1,1], index: 0, kind: input, shape index: {}]   ;;  %s4781_s8 = inlined_call_operand.vmem [shape: f32[256,128], index: 8, kind: output, shape index: {}]  }
   0x1   :  { %v3425_v0 = vld [vmem:[%s4773_s2 + $0x4] ss:$12 sps:$4 sm:$0xff]   ;;  %282 = vmatprep.mubr.bf16.mxu0 %v3633_v1  ;;  %402 = vmatprep.mubr.bf16.mxu1 %v3633_v1  ;;  %v3427_v2 = vld [vmem:[%s4773_s2] ss:$12 sps:$4 sm:$0xff]   ;;  %v3428_v3 = vld [vmem:[%s4773_s2 + $0x1c] ss:$12 sps:$4 sm:$0xff]  }
   0x2   :  { %250 = vmatprep.subr.bf16.mxu0 %v3425_v0  ;;  %3292 = vmatprep.subr.bf16.mxu1 %v3425_v0  ;;  %v3430_v4 = vld [vmem:[%s4773_s2 + $0x18] ss:$12 sps:$4 sm:$0xff]   ;;  %v3432_v6 = vld [vmem:[%s4774_s1 + $0x8] sm:$0xff]   ;;  %v3433_v12 = vld [vmem:[%s4774_s1 + $0x10] sm:$0xff]  }
   0x3   :  { %251 = vmatpush1.bf16.msra.mxu0 %v3427_v2  ;;  %3294 = vmatpush1.bf16.msra.mxu1 %v3427_v2  ;;  %v3431_v5 = vld [vmem:[%s4774_s1] sm:$0xff]   ;;  %v3444_v8 = vld [vmem:[%s4773_s2 + $0x8] ss:$12 sps:$4 sm:$0xff]   ;;  %v3434_v14 = vld [vmem:[%s4774_s1 + $0x18] sm:$0xff]  }
   0x4   :  { %252 = vmatprep.subr.bf16.mxu0 %v3428_v3  ;;  %3293 = vmatprep.subr.bf16.mxu1 %v3428_v3  ;;  %v3704_v7 = vld [vmem:[%s4774_s1 + $0x60] sm:$0xff]   ;;  %v3720_v10 = vld [vmem:[%s4774_s1 + $0x68] sm:$0xff]   ;;  %v3736_v13 = vld [vmem:[%s4774_s1 + $0x70] sm:$0xff]  }
   0x5   :  { %v3447_v9 = vld [vmem:[%s4773_s2 + $0x20] ss:$12 sps:$4 sm:$0xff]   ;;  %v3451_v11 = vld [vmem:[%s4775_s4 + $0x4] ss:$12 sps:$4 sm:$0xff]   ;;  %v3476_v15 = vld [vmem:[%s4775_s4 + $0xc8] ss:$12 sps:$4 sm:$0xff]  }
   0x6   :  { %v3477_v16 = vld [vmem:[%s4775_s4 + $0x8] ss:$12 sps:$4 sm:$0xff]   ;;  %v3755_v17 = vld [vmem:[%s4774_s1 + $0x78] sm:$0xff]   ;;  %v3481_v18 = vld [vmem:[%s4775_s4 + $0xe0] ss:$12 sps:$4 sm:$0xff]  }
   0x7   :  { %253 = vmatpush1.bf16.msra.mxu0 %v3430_v4  ;;  %3295 = vmatpush1.bf16.msra.mxu1 %v3430_v4  ;;  %v3482_v19 = vld [vmem:[%s4775_s4 + $0x20] ss:$12 sps:$4 sm:$0xff]   ;;  %v3486_v21 = vld [vmem:[%s4775_s4 + $0xf8] ss:$12 sps:$4 sm:$0xff]   ;;  %v3491_v23 = vld [vmem:[%s4775_s4 + $0x110] ss:$12 sps:$4 sm:$0xff]  }
   0x8   :  { %3160 = vmatprep.subr.bf16.mxu1 %v3444_v8  ;;  %2888 = vmatprep.subr.bf16.mxu0 %v3476_v15  ;;  %v3435_v20 = vld [vmem:[%s4774_s1 + $0x20] sm:$0xff]   ;;  %v3492_v24 = vld [vmem:[%s4775_s4 + $0x50] ss:$12 sps:$4 sm:$0xff]   ;;  %v3436_v25 = vld [vmem:[%s4774_s1 + $0x28] sm:$0xff]  }
   0x9   :  { %v3487_v22 = vld [vmem:[%s4775_s4 + $0x38] ss:$12 sps:$4 sm:$0xff]   ;;  %v3449_v26 = vld [vmem:[%s4775_s4] ss:$12 sps:$4 sm:$0xff]   ;;  %v3496_v27 = vld [vmem:[%s4775_s4 + $0x128] ss:$12 sps:$4 sm:$0xff]  }
   0xa   :  { %2741 = vmatmul.mubr.msk.bf16.vlgmr.msra.gmra.mrb[0].mxu0 %vm201_vm0, %v3431_v5  ;;  %2753 = vmatmul.mubr.msk.bf16.vlgmr.msra.gmra.mrb[0].mxu1 %vm201_vm0, %v3704_v7  ;;  %v3454_v28 = vld [vmem:[%s4775_s4 + $0x1c] ss:$12 sps:$4 sm:$0xff]   ;;  %v3452_v30 = vld [vmem:[%s4775_s4 + $0x18] ss:$12 sps:$4 sm:$0xff]   ;;  %v3457_v31 = vld [vmem:[%s4775_s4 + $0x34] ss:$12 sps:$4 sm:$0xff]  }
   0xb   :  { %292 = vmatprep.mubr.bf16.mxu0 %v3633_v1  ;;  %3161 = vmatpush3.bf16.msra.mxu1 %v3444_v8  ;;  %v3497_v29 = vld [vmem:[%s4775_s4 + $0x68] ss:$12 sps:$4 sm:$0xff]   ;;  %v3501_v32 = vld [vmem:[%s4775_s4 + $0x140] ss:$12 sps:$4 sm:$0xff]   ;;  %v3455_v34 = vld [vmem:[%s4775_s4 + $0x30] ss:$12 sps:$4 sm:$0xff]  }
   0xc   :  { %412 = vmatprep.mubr.bf16.mxu1 %v3633_v1  ;;  %3162 = vmatprep.subr.bf16.mxu1 %v3447_v9  ;;  %v3437_v33 = vld [vmem:[%s4774_s1 + $0x30] sm:$0xff]   ;;  %v3460_v35 = vld [vmem:[%s4775_s4 + $0x4c] ss:$12 sps:$4 sm:$0xff]   ;;  %v3466_v40 = vld [vmem:[%s4775_s4 + $0x7c] ss:$12 sps:$4 sm:$0xff]  }
   0xd   :  { %2889 = vmatpush3.bf16.msra.mxu0 %v3477_v16  ;;  %v3458_v36 = vld [vmem:[%s4775_s4 + $0x48] ss:$12 sps:$4 sm:$0xff]   ;;  %v3463_v37 = vld [vmem:[%s4775_s4 + $0x64] ss:$12 sps:$4 sm:$0xff]   ;;  %v3438_v38 = vld [vmem:[%s4774_s1 + $0x38] sm:$0xff]  }
   0xe   :  { %2890 = vmatprep.subr.bf16.mxu0 %v3481_v18  ;;  %v3461_v39 = vld [vmem:[%s4775_s4 + $0x60] ss:$12 sps:$4 sm:$0xff]   ;;  %v3464_v41 = vld [vmem:[%s4775_s4 + $0x78] ss:$12 sps:$4 sm:$0xff]   ;;  %v3467_v44 = vld [vmem:[%s4775_s4 + $0x90] ss:$12 sps:$4 sm:$0xff]  }
   0xf   :  { %3163 = vmatpush3.bf16.msra.mxu1 %v3447_v9  ;;  %v3469_v42 = vld [vmem:[%s4775_s4 + $0x94] ss:$12 sps:$4 sm:$0xff]   ;;  %v3472_v45 = vld [vmem:[%s4775_s4 + $0xac] ss:$12 sps:$4 sm:$0xff]   ;;  %v3475_v47 = vld [vmem:[%s4775_s4 + $0xc4] ss:$12 sps:$4 sm:$0xff]  }
  0x10   :  { %1245 = vmatprep.subr.bf16.mxu1 %v3451_v11  ;;  %v3439_v43 = vld [vmem:[%s4774_s1 + $0x40] sm:$0xff]   ;;  %v3470_v46 = vld [vmem:[%s4775_s4 + $0xa8] ss:$12 sps:$4 sm:$0xff]   ;;  %v3442_v54 = vld [vmem:[%s4774_s1 + $0x58] sm:$0xff]  }
  0x11   :  { %2891 = vmatpush3.bf16.msra.mxu0 %v3482_v19  ;;  %v3440_v48 = vld [vmem:[%s4774_s1 + $0x48] sm:$0xff]   ;;  %v3441_v50 = vld [vmem:[%s4774_s1 + $0x50] sm:$0xff]   ;;  %v3478_v52 = vld [vmem:[%s4775_s4 + $0xd8] ss:$12 sps:$4 sm:$0xff]  }
  0x12   :  { %2742 = vmatmul.mubr.msk.bf16.gmra.mrb[4].mxu0 %vm201_vm0, %v3432_v6  ;;  %2754 = vmatmul.mubr.msk.bf16.gmra.mrb[4].mxu1 %vm201_vm0, %v3720_v10  ;;  %v3473_v49 = vld [vmem:[%s4775_s4 + $0xc0] ss:$12 sps:$4 sm:$0xff]   ;;  %v3480_v51 = vld [vmem:[%s4775_s4 + $0xdc] ss:$12 sps:$4 sm:$0xff]   ;;  %v3495_v59 = vld [vmem:[%s4775_s4 + $0x124] ss:$12 sps:$4 sm:$0xff]  }
  0x13   :  { %302 = vmatprep.mubr.bf16.mxu0 %v3633_v1  ;;  %422 = vmatprep.mubr.bf16.mxu1 %v3633_v1  ;;  %v3485_v53 = vld [vmem:[%s4775_s4 + $0xf4] ss:$12 sps:$4 sm:$0xff]   ;;  %v3483_v55 = vld [vmem:[%s4775_s4 + $0xf0] ss:$12 sps:$4 sm:$0xff]   ;;  %v3490_v56 = vld [vmem:[%s4775_s4 + $0x10c] ss:$12 sps:$4 sm:$0xff]  }
  0x14   :  { %2892 = vmatprep.subr.bf16.mxu0 %v3486_v21  ;;  %v3488_v57 = vld [vmem:[%s4775_s4 + $0x108] ss:$12 sps:$4 sm:$0xff]   ;;  %v3502_v58 = vld [vmem:[%s4775_s4 + $0x80] ss:$12 sps:$4 sm:$0xff]   ;;  %v3506_v60 = vld [vmem:[%s4775_s4 + $0x158] ss:$12 sps:$4 sm:$0xff]  }
  0x15   :  { %2893 = vmatpush3.bf16.msra.mxu0 %v3487_v22  ;;  %v3493_v61 = vld [vmem:[%s4775_s4 + $0x120] ss:$12 sps:$4 sm:$0xff]   ;;  %v3507_v62 = vld [vmem:[%s4775_s4 + $0x98] ss:$12 sps:$4 sm:$0xff]   ;;  %v3500_v63 = vld [vmem:[%s4775_s4 + $0x13c] ss:$12 sps:$4 sm:$0xff]  }
  0x16   :  { %2894 = vmatprep.subr.bf16.mxu0 %v3491_v23  ;;  %v3511_v0 = vld [vmem:[%s4775_s4 + $0x170] ss:$12 sps:$4 sm:$0xff]   ;;  %v3498_v2 = vld [vmem:[%s4775_s4 + $0x138] ss:$12 sps:$4 sm:$0xff]   ;;  %v3505_v4 = vld [vmem:[%s4775_s4 + $0x154] ss:$12 sps:$4 sm:$0xff]  }
  0x17   :  { %v3512_v3 = vld [vmem:[%s4775_s4 + $0xb0] ss:$12 sps:$4 sm:$0xff]   ;;  %v3528_v9 = vld [vmem:[%s4775_s4 + $0x188] ss:$12 sps:$4 sm:$0xff]  }
  0x18   :  { %v3515_v8 = vld [vmem:[%s4775_s4 + $0x184] ss:$12 sps:$4 sm:$0xff]  }
  0x19   :  { %2895 = vmatpush3.bf16.msra.mxu0 %v3492_v24 }
  0x1a   :  { %2743 = vmatmul.mubr.msk.bf16.gmra.mrb[8].mxu0 %vm201_vm0, %v3433_v12  ;;  %2755 = vmatmul.mubr.msk.bf16.gmra.mrb[8].mxu1 %vm201_vm0, %v3736_v13 }
  0x1b   :  { %312 = vmatprep.mubr.bf16.mxu0 %v3633_v1  ;;  %432 = vmatprep.mubr.bf16.mxu1 %v3633_v1 }
  0x1c   :  { %2896 = vmatprep.subr.bf16.mxu0 %v3496_v27 }
  0x1d   :  { %2897 = vmatpush3.bf16.msra.mxu0 %v3497_v29 }
  0x1e   :  { %2898 = vmatprep.subr.bf16.mxu0 %v3501_v32 }
  0x21   :  { %2899 = vmatpush3.bf16.msra.mxu0 %v3502_v58  ;;  %v3536_v58 = vld [vmem:[%s4775_s4 + $0x1b8] ss:$12 sps:$4 sm:$0xff]  }
  0x22   :  { %2744 = vmatmul.mubr.msk.bf16.gmra.mrb[12].mxu0 %vm201_vm0, %v3434_v14  ;;  %2756 = vmatmul.mubr.msk.bf16.gmra.mrb[12].mxu1 %vm201_vm0, %v3755_v17 }
  0x23   :  { %322 = vmatprep.mubr.bf16.mxu0 %v3633_v1  ;;  %3164 = vmatprep.mubr.msk.bf16.mxu1 %vm201_vm0, %v3431_v5  ;;  %v3503_v5 = vld [vmem:[%s4775_s4 + $0x150] ss:$12 sps:$4 sm:$0xff]  }
  0x24   :  { %2900 = vmatprep.subr.bf16.mxu0 %v3506_v60 }
  0x25   :  { %2901 = vmatpush3.bf16.msra.mxu0 %v3507_v62 }
  0x26   :  { %2902 = vmatprep.subr.bf16.mxu0 %v3511_v0 }
  0x29   :  { %2903 = vmatpush3.bf16.msra.mxu0 %v3512_v3 }
  0x2a   :  { %2745 = vmatmul.mubr.msk.bf16.gmra.mrb[16].mxu0 %vm201_vm0, %v3435_v20  ;;  %3165 = vmatmul.mubr.msk.bf16.vlgmr.msra.gmra.mrb[16].mxu1 %vm201_vm0, %v3432_v6  ;;  %v3510_v6 = vld [vmem:[%s4775_s4 + $0x16c] ss:$12 sps:$4 sm:$0xff]  }
  0x2b   :  { %332 = vmatprep.mubr.bf16.mxu0 %v3633_v1  ;;  %3168 = vmatprep.mubr.msk.bf16.mxu1 %vm201_vm0, %v3433_v12 }
  0x2c   :  { %1246 = vmatpush1.bf16.msra.mxu1 %v3449_v26  ;;  %3196 = vmatprep.subr.bf16.mxu0 %v3528_v9 }
  0x2d   :  { %1247 = vmatprep.subr.bf16.mxu1 %v3454_v28 }
  0x30   :  { %1248 = vmatpush1.bf16.msra.mxu1 %v3452_v30 }
  0x31   :  { %1249 = vmatprep.subr.bf16.mxu1 %v3457_v31 }
  0x32   :  { %2746 = vmatmul.mubr.msk.bf16.gmra.mrb[20].mxu0 %vm201_vm0, %v3436_v25  ;;  %3169 = vmatmul.mubr.msk.bf16.gmra.mrb[20].mxu1 %vm201_vm0, %v3434_v14 }
  0x33   :  { %342 = vmatprep.mubr.bf16.mxu0 %v3633_v1  ;;  %3172 = vmatprep.mubr.msk.bf16.mxu1 %vm201_vm0, %v3435_v20 }
  0x34   :  { %1250 = vmatpush1.bf16.msra.mxu1 %v3455_v34 }
  0x35   :  { %1251 = vmatprep.subr.bf16.mxu1 %v3460_v35 }
  0x38   :  { %1252 = vmatpush1.bf16.msra.mxu1 %v3458_v36 }
  0x39   :  { %1253 = vmatprep.subr.bf16.mxu1 %v3463_v37 }
  0x3a   :  { %2747 = vmatmul.mubr.msk.bf16.gmra.mrb[24].mxu0 %vm201_vm0, %v3437_v33  ;;  %3173 = vmatmul.mubr.msk.bf16.gmra.mrb[24].mxu1 %vm201_vm0, %v3436_v25 }
  0x3b   :  { %352 = vmatprep.mubr.bf16.mxu0 %v3633_v1  ;;  %3176 = vmatprep.mubr.msk.bf16.mxu1 %vm201_vm0, %v3437_v33  ;;  %v3513_v33 = vld [vmem:[%s4775_s4 + $0x180] ss:$12 sps:$4 sm:$0xff]  }
  0x3c   :  { %1254 = vmatpush1.bf16.msra.mxu1 %v3461_v39 }
  0x3d   :  { %1255 = vmatprep.subr.bf16.mxu1 %v3466_v40  ;;  %v3532_v40 = vld [vmem:[%s4775_s4 + $0x1a0] ss:$12 sps:$4 sm:$0xff]  }
  0x40   :  { %1256 = vmatpush1.bf16.msra.mxu1 %v3464_v41 }
  0x41   :  { %1257 = vmatprep.subr.bf16.mxu1 %v3469_v42 }
  0x42   :  { %2748 = vmatmul.mubr.msk.bf16.gmra.mrb[28].mxu0 %vm201_vm0, %v3438_v38  ;;  %3177 = vmatmul.mubr.msk.bf16.gmra.mrb[28].mxu1 %vm201_vm0, %v3438_v38  ;;  %v3518_v38 = vld [vmem:[%s4775_s4 + $0x19c] ss:$12 sps:$4 sm:$0xff]  }
  0x43   :  { %362 = vmatprep.mubr.bf16.mxu0 %v3633_v1  ;;  %3180 = vmatprep.mubr.msk.bf16.mxu1 %vm201_vm0, %v3439_v43 }
  0x44   :  { %1258 = vmatpush1.bf16.msra.mxu1 %v3467_v44 }
  0x45   :  { %1259 = vmatprep.subr.bf16.mxu1 %v3472_v45 }
  0x48   :  { %1260 = vmatpush1.bf16.msra.mxu1 %v3470_v46 }
  0x49   :  { %1261 = vmatprep.subr.bf16.mxu1 %v3475_v47 }
  0x4a   :  { %2749 = vmatmul.mubr.msk.bf16.gmra.mrb[32].mxu0 %vm201_vm0, %v3439_v43  ;;  %3181 = vmatmul.mubr.msk.bf16.gmra.mrb[32].mxu1 %vm201_vm0, %v3440_v48 }
  0x4b   :  { %372 = vmatprep.mubr.bf16.mxu0 %v3633_v1  ;;  %3184 = vmatprep.mubr.msk.bf16.mxu1 %vm201_vm0, %v3441_v50 }
  0x4c   :  { %1262 = vmatpush1.bf16.msra.mxu1 %v3473_v49 }
  0x4d   :  { %1263 = vmatprep.subr.bf16.mxu1 %v3480_v51 }
  0x50   :  { %1264 = vmatpush1.bf16.msra.mxu1 %v3478_v52  ;;  %v3516_v52 = vld [vmem:[%s4775_s4 + $0x198] ss:$12 sps:$4 sm:$0xff]  }
  0x51   :  { %1265 = vmatprep.subr.bf16.mxu1 %v3485_v53  ;;  %v3521_v53 = vld [vmem:[%s4775_s4 + $0x1b4] ss:$12 sps:$4 sm:$0xff]  }
  0x52   :  { %2750 = vmatmul.mubr.msk.bf16.gmra.mrb[36].mxu0 %vm201_vm0, %v3440_v48  ;;  %3185 = vmatmul.mubr.msk.bf16.gmra.mrb[36].mxu1 %vm201_vm0, %v3442_v54 }
  0x53   :  { %382 = vmatprep.mubr.bf16.mxu0 %v3633_v1  ;;  %3188 = vmatprep.mubr.msk.bf16.mxu1 %vm201_vm0, %v3704_v7  ;;  %v3508_v7 = vld [vmem:[%s4775_s4 + $0x168] ss:$12 sps:$4 sm:$0xff]  }
  0x54   :  { %1266 = vmatpush1.bf16.msra.mxu1 %v3483_v55 }
  0x55   :  { %1267 = vmatprep.subr.bf16.mxu1 %v3490_v56 }
  0x58   :  { %1268 = vmatpush1.bf16.msra.mxu1 %v3488_v57 }
  0x59   :  { %1269 = vmatprep.subr.bf16.mxu1 %v3495_v59 }
  0x5a   :  { %2751 = vmatmul.mubr.msk.bf16.gmra.mrb[40].mxu0 %vm201_vm0, %v3441_v50  ;;  %3189 = vmatmul.mubr.msk.bf16.gmra.mrb[40].mxu1 %vm201_vm0, %v3720_v10  ;;  %v74_v10 = vlaneseq }
  0x5b   :  { %392 = vmatprep.mubr.bf16.mxu0 %v3633_v1  ;;  %3192 = vmatprep.mubr.msk.bf16.mxu1 %vm201_vm0, %v3736_v13  ;;  %v3965_v13 = vld [vmem:[%s4776_s3] sm:$0x7] }
  0x5c   :  { %1270 = vmatpush1.bf16.msra.mxu1 %v3493_v61  ;;  %v3959_v11 = vshrl.u32 %v74_v10, 7 }
  0x5d   :  { %1271 = vmatprep.subr.bf16.mxu1 %v3500_v63 }
  0x5e   :  { %v76_v12 = vsub.s32 0, %v3959_v11  ;;  %v80_v14 = vsub.s32 1, %v3959_v11 }
  0x60   :  { %1272 = vmatpush1.bf16.msra.mxu1 %v3498_v2  ;;  %v3971_v15 = vrot.slane %v3965_v13, %v76_v12  ;;  %v3976_v16 = vrot.slane %v3965_v13, %v80_v14 }
  0x61   :  { %1273 = vmatprep.subr.bf16.mxu1 %v3505_v4  ;;  %v3519_v4 = vld [vmem:[%s4775_s4 + $0x1b0] ss:$12 sps:$4 sm:$0xff]  }
  0x62   :  { %2752 = vmatmul.mubr.msk.bf16.gmra.mrb[44].mxu0 %vm201_vm0, %v3442_v54  ;;  %3193 = vmatmul.mubr.msk.bf16.gmra.mrb[44].mxu1 %vm201_vm0, %v3755_v17 }
  0x64   :  { %1274 = vmatpush1.bf16.msra.mxu1 %v3503_v5 }
  0x65   :  { %1275 = vmatprep.subr.bf16.mxu1 %v3510_v6 }
  0x68   :  { %1276 = vmatpush1.bf16.msra.mxu1 %v3508_v7 }
  0x69   :  { %1438 = vmatprep.subr.bf16.mxu1 %v3515_v8 }
  0xdd   :  { %v284_v17 = vpop.f32.mrb[0].mxu0  ;;  %v404_v30 = vpop.f32.mrb[0].mxu1 }
  0xde   :  { %v285_v18 = vadd.f32 %v284_v17, %v3971_v15  ;;  %v286_v19 = vpop.f32.mrb[1].mxu0  ;;  %v405_v34 = vadd.f32 %v404_v30, %v3971_v15  ;;  %v406_v35 = vpop.f32.mrb[1].mxu1  ;;  %v3527_v30 = vld [vmem:[%s4775_s4 + $0x1e4] ss:$12 sps:$4 sm:$0xff]  }
  0xdf   :  { %v287_v20 = vadd.f32 %v286_v19, %v3976_v16  ;;  %v288_v21 = vpop.f32.mrb[2].mxu0  ;;  %v407_v39 = vadd.f32 %v406_v35, %v3976_v16  ;;  %v408_v41 = vpop.f32.mrb[2].mxu1  ;;  %v3541_v35 = vld [vmem:[%s4775_s4 + $0x1e8] ss:$12 sps:$4 sm:$0xff]  }
  0xe0   :  { %v289_v22 = vadd.f32 %v288_v21, %v3971_v15  ;;  %v290_v23 = vpop.f32.mrb[3].mxu0  ;;  %v604_v25 = vmax.f32 %v285_v18, 0.0  ;;  %v676_v44 = vmax.f32 %v405_v34, 0.0  ;;  %v409_v45 = vadd.f32 %v408_v41, %v3971_v15  ;;  %v410_v46 = vpop.f32.mrb[3].mxu1  ;;  %v3537_v18 = vld [vmem:[%s4775_s4 + $0x1d0] ss:$12 sps:$4 sm:$0xff]  }
  0xe1   :  { %v291_v24 = vadd.f32 %v290_v23, %v3976_v16  ;;  %v605_v27 = vmax.f32 %v287_v20, 0.0  ;;  %v677_v49 = vmax.f32 %v407_v39, 0.0  ;;  %v411_v50 = vadd.f32 %v410_v46, %v3976_v16 }
  0xe2   :  { %v607_v26 = vmax.f32 %v289_v22, 0.0  ;;  %v679_v54 = vmax.f32 %v409_v45, 0.0 }
  0xe3   :  { %v608_v28 = vmax.f32 %v291_v24, 0.0  ;;  %v680_v57 = vmax.f32 %v411_v50, 0.0 }
  0xe4   :  { %v700_v29 = vpack.c.bf16 %v607_v26, %v604_v25  ;;  %v4008_v61 = vpack.c.bf16 %v679_v54, %v676_v44  ;;  %v3525_v44 = vld [vmem:[%s4775_s4 + $0x1e0] ss:$12 sps:$4 sm:$0xff]  }
  0xe5   :  { %v701_v31 = vpack.c.bf16 %v608_v28, %v605_v27  ;;  %v294_v32 = vpop.f32.mrb[4].mxu0  ;;  %v4010_v63 = vpack.c.bf16 %v680_v57, %v677_v49  ;;  %v414_v0 = vpop.f32.mrb[4].mxu1  ;;  %v3531_v49 = vld [vmem:[%s4775_s4 + $0x1fc] ss:$12 sps:$4 sm:$0xff]  }
  0xe6   :  { %v295_v36 = vadd.f32 %v294_v32, %v3971_v15  ;;  %v296_v37 = vpop.f32.mrb[5].mxu0  ;;  %v415_v5 = vadd.f32 %v414_v0, %v3971_v15  ;;  %v416_v6 = vpop.f32.mrb[5].mxu1 }
  0xe7   :  { %v297_v42 = vadd.f32 %v296_v37, %v3976_v16  ;;  %v298_v43 = vpop.f32.mrb[6].mxu0  ;;  %1277 = vmatprep.mubr.bf16.mxu1 %v701_v31  ;;  %1663 = vmatprep.mubr.bf16.mxu0 %v701_v31  ;;  %v417_v10 = vadd.f32 %v416_v6, %v3976_v16  ;;  %v418_v17 = vpop.f32.mrb[6].mxu1 }
  0xe8   :  { %v299_v47 = vadd.f32 %v298_v43, %v3971_v15  ;;  %v300_v48 = vpop.f32.mrb[7].mxu0  ;;  %1278 = vmatmul.mubr.bf16.vlgmr.msra.gmra.mrb[48].mxu1 %v700_v29  ;;  %1664 = vmatmul.mubr.bf16.vlgmr.msra.gmra.mrb[48].mxu0 %v700_v29  ;;  %v610_v55 = vmax.f32 %v295_v36, 0.0  ;;  %v682_v21 = vmax.f32 %v415_v5, 0.0  ;;  %v419_v22 = vadd.f32 %v418_v17, %v3971_v15  ;;  %v420_v23 = vpop.f32.mrb[7].mxu1  ;;  %v3522_v29 = vld [vmem:[%s4775_s4 + $0x1c8] ss:$12 sps:$4 sm:$0xff]  }
  0xe9   :  { %v301_v51 = vadd.f32 %v300_v48, %v3976_v16  ;;  %1439 = vmatpush1.bf16.msra.mxu1 %v3513_v33  ;;  %3197 = vmatpush3.bf16.msra.mxu0 %v3528_v9  ;;  %v611_v59 = vmax.f32 %v297_v42, 0.0  ;;  %v3524_v9 = vld [vmem:[%s4775_s4 + $0x1cc] ss:$12 sps:$4 sm:$0xff]   ;;  %v683_v26 = vmax.f32 %v417_v10, 0.0  ;;  %v421_v27 = vadd.f32 %v420_v23, %v3976_v16  ;;  %v3533_v23 = vld [vmem:[%s4775_s4 + $0x210] ss:$12 sps:$4 sm:$0xff]  }
  0xea   :  { %v613_v56 = vmax.f32 %v299_v47, 0.0  ;;  %1440 = vmatprep.subr.bf16.mxu1 %v3518_v38  ;;  %3198 = vmatprep.subr.bf16.mxu0 %v3532_v40  ;;  %v685_v31 = vmax.f32 %v419_v22, 0.0 }
  0xeb   :  { %v614_v60 = vmax.f32 %v301_v51, 0.0  ;;  %v686_v34 = vmax.f32 %v421_v27, 0.0 }
  0xec   :  { %v703_v62 = vpack.c.bf16 %v613_v56, %v610_v55  ;;  %v4038_v38 = vpack.c.bf16 %v685_v31, %v682_v21  ;;  %v3540_v31 = vld [vmem:[%s4775_s4 + $0x22c] ss:$12 sps:$4 sm:$0xff]  }
  0xed   :  { %v704_v2 = vpack.c.bf16 %v614_v60, %v611_v59  ;;  %v304_v3 = vpop.f32.mrb[8].mxu0  ;;  %1441 = vmatpush1.bf16.msra.mxu1 %v3516_v52  ;;  %3199 = vmatpush3.bf16.msra.mxu0 %v3532_v40  ;;  %v4040_v40 = vpack.c.bf16 %v686_v34, %v683_v26  ;;  %v424_v41 = vpop.f32.mrb[8].mxu1  ;;  %v3542_v52 = vld [vmem:[%s4775_s4 + $0x200] ss:$12 sps:$4 sm:$0xff]   ;;  %v84_v26 = vsub.s32 2, %v3959_v11 }
  0xee   :  { %v305_v7 = vadd.f32 %v304_v3, %v3971_v15  ;;  %v306_v8 = vpop.f32.mrb[9].mxu0  ;;  %1442 = vmatprep.subr.bf16.mxu1 %v3521_v53  ;;  %3200 = vmatprep.subr.bf16.mxu0 %v3536_v58  ;;  %v425_v45 = vadd.f32 %v424_v41, %v3971_v15  ;;  %v426_v46 = vpop.f32.mrb[9].mxu1  ;;  %v3535_v3 = vld [vmem:[%s4775_s4 + $0x214] ss:$12 sps:$4 sm:$0xff]  }
  0xef   :  { %v307_v19 = vadd.f32 %v306_v8, %v3976_v16  ;;  %v308_v20 = vpop.f32.mrb[10].mxu0  ;;  %1287 = vmatprep.mubr.bf16.mxu1 %v704_v2  ;;  %1671 = vmatprep.mubr.bf16.mxu0 %v704_v2  ;;  %v427_v50 = vadd.f32 %v426_v46, %v3976_v16  ;;  %v428_v51 = vpop.f32.mrb[10].mxu1  ;;  %v3529_v2 = vld [vmem:[%s4775_s4 + $0x1f8] ss:$12 sps:$4 sm:$0xff]   ;;  %v3538_v46 = vld [vmem:[%s4775_s4 + $0x228] ss:$12 sps:$4 sm:$0xff]  }
  0xf0   :  { %v309_v24 = vadd.f32 %v308_v20, %v3971_v15  ;;  %v310_v25 = vpop.f32.mrb[11].mxu0  ;;  %1288 = vmatmul.mubr.bf16.gmra.mrb[52].mxu1 %v703_v62  ;;  %1672 = vmatmul.mubr.bf16.gmra.mrb[52].mxu0 %v703_v62  ;;  %v616_v32 = vmax.f32 %v305_v7, 0.0  ;;  %v688_v55 = vmax.f32 %v425_v45, 0.0  ;;  %v429_v56 = vadd.f32 %v428_v51, %v3971_v15  ;;  %v430_v57 = vpop.f32.mrb[11].mxu1  ;;  %v3543_v8 = vld [vmem:[%s4775_s4 + $0x218] ss:$12 sps:$4 sm:$0xff]  }
  0xf1   :  { %v311_v28 = vadd.f32 %v310_v25, %v3976_v16  ;;  %1443 = vmatpush1.bf16.msra.mxu1 %v3519_v4  ;;  %3201 = vmatpush3.bf16.msra.mxu0 %v3536_v58  ;;  %v617_v36 = vmax.f32 %v307_v19, 0.0  ;;  %v689_v60 = vmax.f32 %v427_v50, 0.0  ;;  %v431_v62 = vadd.f32 %v430_v57, %v3976_v16 }
  0xf2   :  { %v619_v33 = vmax.f32 %v309_v24, 0.0  ;;  %1444 = vmatprep.subr.bf16.mxu1 %v3524_v9  ;;  %3202 = vmatprep.subr.bf16.mxu0 %v3537_v18  ;;  %v691_v4 = vmax.f32 %v429_v56, 0.0 }
  0xf3   :  { %v620_v37 = vmax.f32 %v311_v28, 0.0  ;;  %v692_v7 = vmax.f32 %v431_v62, 0.0 }
  0xf4   :  { %v706_v39 = vpack.c.bf16 %v619_v33, %v616_v32  ;;  %v4068_v17 = vpack.c.bf16 %v691_v4, %v688_v55  ;;  %v3544_v32 = vld [vmem:[%s4775_s4 + $0x230] ss:$12 sps:$4 sm:$0xff]  }
  0xf5   :  { %v707_v42 = vpack.c.bf16 %v620_v37, %v617_v36  ;;  %v314_v43 = vpop.f32.mrb[12].mxu0  ;;  %1445 = vmatpush1.bf16.msra.mxu1 %v3522_v29  ;;  %3203 = vmatpush3.bf16.msra.mxu0 %v3537_v18  ;;  %v4070_v19 = vpack.c.bf16 %v692_v7, %v689_v60  ;;  %v434_v20 = vpop.f32.mrb[12].mxu1 }
  0xf6   :  { %v315_v47 = vadd.f32 %v314_v43, %v3971_v15  ;;  %v316_v48 = vpop.f32.mrb[13].mxu0  ;;  %1446 = vmatprep.subr.bf16.mxu1 %v3527_v30  ;;  %3204 = vmatprep.subr.bf16.mxu0 %v3541_v35  ;;  %v435_v24 = vadd.f32 %v434_v20, %v3971_v15  ;;  %v436_v25 = vpop.f32.mrb[13].mxu1 }
  0xf7   :  { %v317_v53 = vadd.f32 %v316_v48, %v3976_v16  ;;  %v318_v54 = vpop.f32.mrb[14].mxu0  ;;  %1297 = vmatprep.mubr.bf16.mxu1 %v707_v42  ;;  %1679 = vmatprep.mubr.bf16.mxu0 %v707_v42  ;;  %v437_v29 = vadd.f32 %v436_v25, %v3976_v16  ;;  %v438_v30 = vpop.f32.mrb[14].mxu1 }
  0xf8   :  { %v319_v58 = vadd.f32 %v318_v54, %v3971_v15  ;;  %v320_v59 = vpop.f32.mrb[15].mxu0  ;;  %1298 = vmatmul.mubr.bf16.gmra.mrb[56].mxu1 %v706_v39  ;;  %1680 = vmatmul.mubr.bf16.gmra.mrb[56].mxu0 %v706_v39  ;;  %v622_v5 = vmax.f32 %v315_v47, 0.0  ;;  %v439_v36 = vadd.f32 %v438_v30, %v3971_v15  ;;  %v440_v37 = vpop.f32.mrb[15].mxu1  ;;  %v4096_v47 = vrot.slane %v3965_v13, %v84_v26 }
  0xf9   :  { %v321_v0 = vadd.f32 %v320_v59, %v3976_v16  ;;  %1447 = vmatpush1.bf16.msra.mxu1 %v3525_v44  ;;  %3205 = vmatpush3.bf16.msra.mxu0 %v3541_v35  ;;  %v623_v9 = vmax.f32 %v317_v53, 0.0  ;;  %v694_v35 = vmax.f32 %v435_v24, 0.0  ;;  %v695_v42 = vmax.f32 %v437_v29, 0.0 }
  0xfa   :  { %v625_v6 = vmax.f32 %v319_v58, 0.0  ;;  %1448 = vmatprep.subr.bf16.mxu1 %v3531_v49  ;;  %3206 = vmatprep.subr.bf16.mxu0 %v3542_v52  ;;  %v441_v43 = vadd.f32 %v440_v37, %v3976_v16  ;;  %v697_v45 = vmax.f32 %v439_v36, 0.0 }
  0xfb   :  { %v626_v10 = vmax.f32 %v321_v0, 0.0 }
  0xfc   :  { %v709_v18 = vpack.c.bf16 %v625_v6, %v622_v5  ;;  %v698_v50 = vmax.f32 %v441_v43, 0.0  ;;  %v4098_v53 = vpack.c.bf16 %v697_v45, %v694_v35 }
  0xfd   :  { %v710_v21 = vpack.c.bf16 %v626_v10, %v623_v9  ;;  %v324_v22 = vpop.f32.mrb[16].mxu0  ;;  %1449 = vmatpush1.bf16.msra.mxu1 %v3529_v2  ;;  %3207 = vmatpush3.bf16.msra.mxu0 %v3542_v52  ;;  %v3166_v56 = vpop.f32.mrb[16].mxu1 }
  0xfe   :  { %v325_v27 = vadd.f32 %v324_v22, %v3971_v15  ;;  %v326_v28 = vpop.f32.mrb[17].mxu0  ;;  %1450 = vmatprep.subr.bf16.mxu1 %v3535_v3  ;;  %3208 = vmatprep.subr.bf16.mxu0 %v3543_v8  ;;  %v4100_v55 = vpack.c.bf16 %v698_v50, %v695_v42  ;;  %v486_v13 = vadd.f32 %v3166_v56, %v4096_v47  ;;  %v477_v59 = vpop.f32.mrb[17].mxu1 }
  0xff   :  { %v327_v33 = vadd.f32 %v326_v28, %v3976_v16  ;;  %v328_v34 = vpop.f32.mrb[18].mxu0  ;;  %1307 = vmatprep.mubr.bf16.mxu1 %v710_v21  ;;  %1687 = vmatprep.mubr.bf16.mxu0 %v710_v21  ;;  %v478_v0 = vadd.f32 %v477_v59, %v4096_v47  ;;  %v3167_v2 = vpop.f32.mrb[18].mxu1 }
 0x100   :  { %v329_v39 = vadd.f32 %v328_v34, %v3971_v15  ;;  %v330_v41 = vpop.f32.mrb[19].mxu0  ;;  %1308 = vmatmul.mubr.bf16.gmra.mrb[60].mxu1 %v709_v18  ;;  %1688 = vmatmul.mubr.bf16.gmra.mrb[60].mxu0 %v709_v18  ;;  %v628_v48 = vmax.f32 %v325_v27, 0.0  ;;  %v612_v5 = vmax.f32 %v486_v13, 0.0  ;;  %v489_v6 = vadd.f32 %v3167_v2, %v4096_v47  ;;  %v480_v7 = vpop.f32.mrb[19].mxu1 }
 0x101   :  { %v331_v44 = vadd.f32 %v330_v41, %v3976_v16  ;;  %1451 = vmatpush1.bf16.msra.mxu1 %v3533_v23  ;;  %3209 = vmatpush3.bf16.msra.mxu0 %v3543_v8  ;;  %v629_v51 = vmax.f32 %v327_v33, 0.0  ;;  %v606_v10 = vmax.f32 %v478_v0, 0.0  ;;  %v481_v18 = vadd.f32 %v480_v7, %v4096_v47 }
 0x102   :  { %v631_v49 = vmax.f32 %v329_v39, 0.0  ;;  %1452 = vmatprep.subr.bf16.mxu1 %v3540_v31  ;;  %3210 = vmatprep.subr.bf16.mxu0 %v3544_v32  ;;  %v615_v21 = vmax.f32 %v489_v6, 0.0 }
 0x103   :  { %v632_v52 = vmax.f32 %v331_v44, 0.0  ;;  %v609_v24 = vmax.f32 %v481_v18, 0.0 }
 0x104   :  { %v712_v54 = vpack.c.bf16 %v631_v49, %v628_v48  ;;  %v4110_v28 = vpack.c.bf16 %v615_v21, %v612_v5 }
 0x105   :  { %v713_v57 = vpack.c.bf16 %v632_v52, %v629_v51  ;;  %v334_v58 = vpop.f32.mrb[20].mxu0  ;;  %1453 = vmatpush1.bf16.msra.mxu1 %v3538_v46  ;;  %3211 = vmatpush3.bf16.msra.mxu0 %v3544_v32  ;;  %v4112_v30 = vpack.c.bf16 %v609_v24, %v606_v10  ;;  %v3170_v31 = vpop.f32.mrb[20].mxu1 }
 0x106   :  { %v335_v60 = vadd.f32 %v334_v58, %v3971_v15  ;;  %v336_v62 = vpop.f32.mrb[21].mxu0  ;;  %v502_v34 = vadd.f32 %v3170_v31, %v4096_v47  ;;  %v493_v35 = vpop.f32.mrb[21].mxu1 }
 0x107   :  { %v337_v3 = vadd.f32 %v336_v62, %v3976_v16  ;;  %v338_v4 = vpop.f32.mrb[22].mxu0  ;;  %1317 = vmatprep.mubr.bf16.mxu1 %v713_v57  ;;  %1695 = vmatprep.mubr.bf16.mxu0 %v713_v57  ;;  %v494_v39 = vadd.f32 %v493_v35, %v4096_v47  ;;  %v3171_v41 = vpop.f32.mrb[22].mxu1 }
 0x108   :  { %v339_v8 = vadd.f32 %v338_v4, %v3971_v15  ;;  %v340_v9 = vpop.f32.mrb[23].mxu0  ;;  %1318 = vmatmul.mubr.bf16.gmra.mrb[64].mxu1 %v712_v54  ;;  %1696 = vmatmul.mubr.bf16.gmra.mrb[64].mxu0 %v712_v54  ;;  %v634_v22 = vmax.f32 %v335_v60, 0.0  ;;  %v624_v44 = vmax.f32 %v502_v34, 0.0  ;;  %v505_v45 = vadd.f32 %v3171_v41, %v4096_v47  ;;  %v496_v46 = vpop.f32.mrb[23].mxu1 }
 0x109   :  { %v341_v20 = vadd.f32 %v340_v9, %v3976_v16  ;;  %v635_v25 = vmax.f32 %v337_v3, 0.0  ;;  %v618_v50 = vmax.f32 %v494_v39, 0.0  ;;  %v497_v51 = vadd.f32 %v496_v46, %v4096_v47 }
 0x10a   :  { %v637_v23 = vmax.f32 %v339_v8, 0.0  ;;  %v627_v54 = vmax.f32 %v505_v45, 0.0 }
 0x10b   :  { %v638_v27 = vmax.f32 %v341_v20, 0.0  ;;  %v621_v58 = vmax.f32 %v497_v51, 0.0 }
 0x10c   :  { %v715_v29 = vpack.c.bf16 %v637_v23, %v634_v22  ;;  %v4122_v60 = vpack.c.bf16 %v627_v54, %v624_v44 }
 0x10d   :  { %v716_v32 = vpack.c.bf16 %v638_v27, %v635_v25  ;;  %v344_v33 = vpop.f32.mrb[24].mxu0  ;;  %v4124_v0 = vpack.c.bf16 %v621_v58, %v618_v50  ;;  %v3174_v2 = vpop.f32.mrb[24].mxu1 }
 0x10e   :  { %v345_v36 = vadd.f32 %v344_v33, %v3971_v15  ;;  %v346_v37 = vpop.f32.mrb[25].mxu0  ;;  %v518_v5 = vadd.f32 %v3174_v2, %v4096_v47  ;;  %v509_v6 = vpop.f32.mrb[25].mxu1 }
 0x10f   :  { %v347_v42 = vadd.f32 %v346_v37, %v3976_v16  ;;  %v348_v43 = vpop.f32.mrb[26].mxu0  ;;  %1327 = vmatprep.mubr.bf16.mxu1 %v716_v32  ;;  %1703 = vmatprep.mubr.bf16.mxu0 %v716_v32  ;;  %v510_v9 = vadd.f32 %v509_v6, %v4096_v47  ;;  %v3175_v10 = vpop.f32.mrb[26].mxu1 }
 0x110   :  { %v349_v48 = vadd.f32 %v348_v43, %v3971_v15  ;;  %v350_v49 = vpop.f32.mrb[27].mxu0  ;;  %1328 = vmatmul.mubr.bf16.gmra.mrb[68].mxu1 %v715_v29  ;;  %1704 = vmatmul.mubr.bf16.gmra.mrb[68].mxu0 %v715_v29  ;;  %v640_v56 = vmax.f32 %v345_v36, 0.0  ;;  %v636_v21 = vmax.f32 %v518_v5, 0.0  ;;  %v521_v22 = vadd.f32 %v3175_v10, %v4096_v47  ;;  %v512_v23 = vpop.f32.mrb[27].mxu1 }
 0x111   :  { %v351_v52 = vadd.f32 %v350_v49, %v3976_v16  ;;  %v641_v13 = vmax.f32 %v347_v42, 0.0  ;;  %v630_v27 = vmax.f32 %v510_v9, 0.0  ;;  %v513_v29 = vadd.f32 %v512_v23, %v4096_v47 }
 0x112   :  { %v643_v57 = vmax.f32 %v349_v48, 0.0  ;;  %v639_v32 = vmax.f32 %v521_v22, 0.0 }
 0x113   :  { %v644_v59 = vmax.f32 %v351_v52, 0.0  ;;  %v633_v35 = vmax.f32 %v513_v29, 0.0 }
 0x114   :  { %v718_v62 = vpack.c.bf16 %v643_v57, %v640_v56  ;;  %v4134_v39 = vpack.c.bf16 %v639_v32, %v636_v21 }
 0x115   :  { %v719_v3 = vpack.c.bf16 %v644_v59, %v641_v13  ;;  %v354_v4 = vpop.f32.mrb[28].mxu0  ;;  %v4136_v42 = vpack.c.bf16 %v633_v35, %v630_v27  ;;  %v3178_v43 = vpop.f32.mrb[28].mxu1 }
 0x116   :  { %v355_v7 = vadd.f32 %v354_v4, %v3971_v15  ;;  %v356_v8 = vpop.f32.mrb[29].mxu0  ;;  %v534_v46 = vadd.f32 %v3178_v43, %v4096_v47  ;;  %v525_v48 = vpop.f32.mrb[29].mxu1 }
 0x117   :  { %v357_v18 = vadd.f32 %v356_v8, %v3976_v16  ;;  %v358_v20 = vpop.f32.mrb[30].mxu0  ;;  %1337 = vmatprep.mubr.bf16.mxu1 %v719_v3  ;;  %1711 = vmatprep.mubr.bf16.mxu0 %v719_v3  ;;  %v526_v51 = vadd.f32 %v525_v48, %v4096_v47  ;;  %v3179_v52 = vpop.f32.mrb[30].mxu1 }
 0x118   :  { %v359_v24 = vadd.f32 %v358_v20, %v3971_v15  ;;  %v360_v25 = vpop.f32.mrb[31].mxu0  ;;  %1338 = vmatmul.mubr.bf16.gmra.mrb[72].mxu1 %v718_v62  ;;  %1712 = vmatmul.mubr.bf16.gmra.mrb[72].mxu0 %v718_v62  ;;  %v646_v33 = vmax.f32 %v355_v7, 0.0  ;;  %v648_v57 = vmax.f32 %v534_v46, 0.0  ;;  %v537_v58 = vadd.f32 %v3179_v52, %v4096_v47  ;;  %v528_v13 = vpop.f32.mrb[31].mxu1 }
 0x119   :  { %v361_v31 = vadd.f32 %v360_v25, %v3976_v16  ;;  %v647_v36 = vmax.f32 %v357_v18, 0.0  ;;  %v642_v2 = vmax.f32 %v526_v51, 0.0  ;;  %v529_v3 = vadd.f32 %v528_v13, %v4096_v47 }
 0x11a   :  { %v649_v34 = vmax.f32 %v359_v24, 0.0  ;;  %v651_v5 = vmax.f32 %v537_v58, 0.0 }
 0x11b   :  { %v650_v37 = vmax.f32 %v361_v31, 0.0  ;;  %v645_v8 = vmax.f32 %v529_v3, 0.0 }
 0x11c   :  { %v721_v41 = vpack.c.bf16 %v649_v34, %v646_v33  ;;  %v4146_v18 = vpack.c.bf16 %v651_v5, %v648_v57 }
 0x11d   :  { %v722_v44 = vpack.c.bf16 %v650_v37, %v647_v36  ;;  %v364_v45 = vpop.f32.mrb[32].mxu0  ;;  %v4148_v21 = vpack.c.bf16 %v645_v8, %v642_v2  ;;  %v3182_v22 = vpop.f32.mrb[32].mxu1 }
 0x11e   :  { %v365_v49 = vadd.f32 %v364_v45, %v3971_v15  ;;  %v366_v50 = vpop.f32.mrb[33].mxu0  ;;  %v550_v25 = vadd.f32 %v3182_v22, %v4096_v47  ;;  %v541_v27 = vpop.f32.mrb[33].mxu1 }
 0x11f   :  { %v367_v54 = vadd.f32 %v366_v50, %v3976_v16  ;;  %v368_v56 = vpop.f32.mrb[34].mxu0  ;;  %1347 = vmatprep.mubr.bf16.mxu1 %v722_v44  ;;  %1719 = vmatprep.mubr.bf16.mxu0 %v722_v44  ;;  %v542_v32 = vadd.f32 %v541_v27, %v4096_v47  ;;  %v3183_v33 = vpop.f32.mrb[34].mxu1 }
 0x120   :  { %v369_v59 = vadd.f32 %v368_v56, %v3971_v15  ;;  %v370_v62 = vpop.f32.mrb[35].mxu0  ;;  %1348 = vmatmul.mubr.bf16.gmra.mrb[76].mxu1 %v721_v41  ;;  %1720 = vmatmul.mubr.bf16.gmra.mrb[76].mxu0 %v721_v41  ;;  %v652_v6 = vmax.f32 %v365_v49, 0.0  ;;  %v660_v36 = vmax.f32 %v550_v25, 0.0  ;;  %v553_v37 = vadd.f32 %v3183_v33, %v4096_v47  ;;  %v544_v41 = vpop.f32.mrb[35].mxu1 }
 0x121   :  { %v371_v4 = vadd.f32 %v370_v62, %v3976_v16  ;;  %v653_v9 = vmax.f32 %v367_v54, 0.0  ;;  %v654_v45 = vmax.f32 %v542_v32, 0.0  ;;  %v545_v46 = vadd.f32 %v544_v41, %v4096_v47 }
 0x122   :  { %v655_v7 = vmax.f32 %v369_v59, 0.0  ;;  %v663_v49 = vmax.f32 %v553_v37, 0.0 }
 0x123   :  { %v656_v10 = vmax.f32 %v371_v4, 0.0  ;;  %v657_v52 = vmax.f32 %v545_v46, 0.0 }
 0x124   :  { %v724_v20 = vpack.c.bf16 %v655_v7, %v652_v6  ;;  %v4158_v57 = vpack.c.bf16 %v663_v49, %v660_v36 }
 0x125   :  { %v725_v23 = vpack.c.bf16 %v656_v10, %v653_v9  ;;  %v374_v24 = vpop.f32.mrb[36].mxu0  ;;  %v4160_v13 = vpack.c.bf16 %v657_v52, %v654_v45  ;;  %v3186_v59 = vpop.f32.mrb[36].mxu1 }
 0x126   :  { %v375_v29 = vadd.f32 %v374_v24, %v3971_v15  ;;  %v376_v31 = vpop.f32.mrb[37].mxu0  ;;  %v566_v3 = vadd.f32 %v3186_v59, %v4096_v47  ;;  %v557_v4 = vpop.f32.mrb[37].mxu1 }
 0x127   :  { %v377_v34 = vadd.f32 %v376_v31, %v3976_v16  ;;  %v378_v35 = vpop.f32.mrb[38].mxu0  ;;  %1357 = vmatprep.mubr.bf16.mxu1 %v725_v23  ;;  %1727 = vmatprep.mubr.bf16.mxu0 %v725_v23  ;;  %v558_v7 = vadd.f32 %v557_v4, %v4096_v47  ;;  %v3187_v8 = vpop.f32.mrb[38].mxu1 }
 0x128   :  { %v379_v43 = vadd.f32 %v378_v35, %v3971_v15  ;;  %v380_v44 = vpop.f32.mrb[39].mxu0  ;;  %1358 = vmatmul.mubr.bf16.gmra.mrb[80].mxu1 %v724_v20  ;;  %1728 = vmatmul.mubr.bf16.gmra.mrb[80].mxu0 %v724_v20  ;;  %v658_v50 = vmax.f32 %v375_v29, 0.0  ;;  %v672_v20 = vmax.f32 %v566_v3, 0.0  ;;  %v569_v22 = vadd.f32 %v3187_v8, %v4096_v47  ;;  %v560_v23 = vpop.f32.mrb[39].mxu1 }
 0x129   :  { %v381_v48 = vadd.f32 %v380_v44, %v3976_v16  ;;  %v659_v54 = vmax.f32 %v377_v34, 0.0  ;;  %v666_v27 = vmax.f32 %v558_v7, 0.0  ;;  %v561_v29 = vadd.f32 %v560_v23, %v4096_v47 }
 0x12a   :  { %v661_v51 = vmax.f32 %v379_v43, 0.0  ;;  %v675_v32 = vmax.f32 %v569_v22, 0.0 }
 0x12b   :  { %v662_v56 = vmax.f32 %v381_v48, 0.0  ;;  %v669_v35 = vmax.f32 %v561_v29, 0.0 }
 0x12c   :  { %v727_v58 = vpack.c.bf16 %v661_v51, %v658_v50  ;;  %v4170_v41 = vpack.c.bf16 %v675_v32, %v672_v20 }
 0x12d   :  { %v728_v62 = vpack.c.bf16 %v662_v56, %v659_v54  ;;  %v384_v2 = vpop.f32.mrb[40].mxu0  ;;  %v4172_v44 = vpack.c.bf16 %v669_v35, %v666_v27  ;;  %v3190_v45 = vpop.f32.mrb[40].mxu1 }
 0x12e   :  { %v385_v5 = vadd.f32 %v384_v2, %v3971_v15  ;;  %v386_v6 = vpop.f32.mrb[41].mxu0  ;;  %v582_v49 = vadd.f32 %v3190_v45, %v4096_v47  ;;  %v573_v50 = vpop.f32.mrb[41].mxu1 }
 0x12f   :  { %v387_v9 = vadd.f32 %v386_v6, %v3976_v16  ;;  %v388_v10 = vpop.f32.mrb[42].mxu0  ;;  %1367 = vmatprep.mubr.bf16.mxu1 %v728_v62  ;;  %1735 = vmatprep.mubr.bf16.mxu0 %v728_v62  ;;  %v574_v54 = vadd.f32 %v573_v50, %v4096_v47  ;;  %v3191_v56 = vpop.f32.mrb[42].mxu1 }
 0x130   :  { %v389_v24 = vadd.f32 %v388_v10, %v3971_v15  ;;  %v390_v25 = vpop.f32.mrb[43].mxu0  ;;  %1368 = vmatmul.mubr.bf16.gmra.mrb[84].mxu1 %v727_v58  ;;  %1736 = vmatmul.mubr.bf16.gmra.mrb[84].mxu0 %v727_v58  ;;  %v664_v33 = vmax.f32 %v385_v5, 0.0  ;;  %v684_v62 = vmax.f32 %v582_v49, 0.0  ;;  %v585_v2 = vadd.f32 %v3191_v56, %v4096_v47  ;;  %v576_v3 = vpop.f32.mrb[43].mxu1  ;;  %v3567_v56 = vld [vmem:[%s4777_s6 + $0xb0] sm:$0xff]  }
 0x131   :  { %v391_v31 = vadd.f32 %v390_v25, %v3976_v16  ;;  %v665_v36 = vmax.f32 %v387_v9, 0.0  ;;  %v678_v6 = vmax.f32 %v574_v54, 0.0  ;;  %v577_v7 = vadd.f32 %v576_v3, %v4096_v47  ;;  %v3568_v3 = vld [vmem:[%s4777_s6 + $0xb8] sm:$0xff]  }
 0x132   :  { %v667_v34 = vmax.f32 %v389_v24, 0.0  ;;  %v687_v9 = vmax.f32 %v585_v2, 0.0 }
 0x133   :  { %v668_v37 = vmax.f32 %v391_v31, 0.0  ;;  %v681_v22 = vmax.f32 %v577_v7, 0.0 }
 0x134   :  { %v730_v43 = vpack.c.bf16 %v667_v34, %v664_v33  ;;  %v4182_v25 = vpack.c.bf16 %v687_v9, %v684_v62 }
 0x135   :  { %v731_v46 = vpack.c.bf16 %v668_v37, %v665_v36  ;;  %v394_v48 = vpop.f32.mrb[44].mxu0  ;;  %v4184_v29 = vpack.c.bf16 %v681_v22, %v678_v6 }
 0x136   :  { %v395_v51 = vadd.f32 %v394_v48, %v3971_v15  ;;  %v396_v52 = vpop.f32.mrb[45].mxu0 }
 0x137   :  { %v397_v58 = vadd.f32 %v396_v52, %v3976_v16  ;;  %v398_v59 = vpop.f32.mrb[46].mxu0  ;;  %1377 = vmatprep.mubr.bf16.mxu1 %v731_v46  ;;  %1743 = vmatprep.mubr.bf16.mxu0 %v731_v46 }
 0x138   :  { %v399_v4 = vadd.f32 %v398_v59, %v3971_v15  ;;  %v400_v5 = vpop.f32.mrb[47].mxu0  ;;  %1378 = vmatmul.mubr.bf16.gmra.mrb[88].mxu1 %v730_v43  ;;  %1744 = vmatmul.mubr.bf16.gmra.mrb[88].mxu0 %v730_v43  ;;  %v670_v10 = vmax.f32 %v395_v51, 0.0  ;;  %v3194_v15 = vpop.f32.mrb[44].mxu1  ;;  %v3562_v51 = vld [vmem:[%s4777_s6 + $0x30] sm:$0xff]  }
 0x139   :  { %v401_v8 = vadd.f32 %v400_v5, %v3976_v16  ;;  %v671_v23 = vmax.f32 %v397_v58, 0.0  ;;  %v598_v32 = vadd.f32 %v3194_v15, %v4096_v47  ;;  %v589_v33 = vpop.f32.mrb[45].mxu1 }
 0x13a   :  { %v673_v20 = vmax.f32 %v399_v4, 0.0  ;;  %v590_v34 = vadd.f32 %v589_v33, %v4096_v47  ;;  %v3195_v35 = vpop.f32.mrb[46].mxu1  ;;  %v3566_v4 = vld [vmem:[%s4777_s6 + $0x38] sm:$0xff]  }
 0x13b   :  { %v674_v24 = vmax.f32 %v401_v8, 0.0  ;;  %v696_v16 = vmax.f32 %v598_v32, 0.0  ;;  %v601_v36 = vadd.f32 %v3195_v35, %v4096_v47  ;;  %v592_v37 = vpop.f32.mrb[47].mxu1 }
 0x13c   :  { %v733_v27 = vpack.c.bf16 %v673_v20, %v670_v10  ;;  %v690_v43 = vmax.f32 %v590_v34, 0.0  ;;  %v593_v45 = vadd.f32 %v592_v37, %v4096_v47  ;;  %v3551_v47 = vld [vmem:[%s4777_s6 + $0x10] sm:$0xff]  }
 0x13d   :  { %v734_v31 = vpack.c.bf16 %v674_v24, %v671_v23  ;;  %v699_v46 = vmax.f32 %v601_v36, 0.0 }
 0x13e   :  { %v693_v48 = vmax.f32 %v593_v45, 0.0 }
 0x13f   :  { %1387 = vmatprep.mubr.bf16.mxu1 %v734_v31  ;;  %1751 = vmatprep.mubr.bf16.mxu0 %v734_v31  ;;  %v4192_v49 = vpack.c.bf16 %v699_v46, %v696_v16 }
 0x140   :  { %1388 = vmatmul.mubr.bf16.gmra.mrb[92].mxu1 %v733_v27  ;;  %1752 = vmatmul.mubr.bf16.gmra.mrb[92].mxu0 %v733_v27  ;;  %v4194_v50 = vpack.c.bf16 %v693_v48, %v690_v43 }
 0x141   :  { %1397 = vmatprep.mubr.bf16.mxu1 %v4010_v63  ;;  %1759 = vmatprep.mubr.bf16.mxu0 %v4010_v63  ;;  %v3546_v63 = vld [vmem:[%s4777_s6] sm:$0xff]  }
 0x148   :  { %1398 = vmatmul.mubr.bf16.gmra.mrb[96].mxu1 %v4008_v61  ;;  %1760 = vmatmul.mubr.bf16.gmra.mrb[96].mxu0 %v4008_v61  ;;  %v3545_v61 = vld [vmem:[%s4777_s6 + $0x40] sm:$0xff]  }
 0x149   :  { %1407 = vmatprep.mubr.bf16.mxu1 %v4040_v40  ;;  %1767 = vmatprep.mubr.bf16.mxu0 %v4040_v40  ;;  %v3548_v40 = vld [vmem:[%s4777_s6 + $0x48] sm:$0xff]  }
 0x14a   :  { %3024 = vmatprep.subr.bf16.mxu0 %v3545_v61 }
 0x150   :  { %1408 = vmatmul.mubr.bf16.gmra.mrb[100].mxu1 %v4038_v38  ;;  %1768 = vmatmul.mubr.bf16.gmra.mrb[100].mxu0 %v4038_v38  ;;  %v3547_v38 = vld [vmem:[%s4777_s6 + $0x80] sm:$0xff]  }
 0x151   :  { %1417 = vmatprep.mubr.bf16.mxu1 %v4070_v19  ;;  %1775 = vmatprep.mubr.bf16.mxu0 %v4070_v19  ;;  %v3550_v19 = vld [vmem:[%s4777_s6 + $0x50] sm:$0xff]  }
 0x152   :  { %3244 = vmatprep.subr.bf16.mxu1 %v3547_v38 }
 0x158   :  { %1418 = vmatmul.mubr.bf16.gmra.mrb[104].mxu1 %v4068_v17  ;;  %1776 = vmatmul.mubr.bf16.gmra.mrb[104].mxu0 %v4068_v17  ;;  %v3549_v17 = vld [vmem:[%s4777_s6 + $0x8] sm:$0xff]  }
 0x159   :  { %1427 = vmatprep.mubr.bf16.mxu1 %v4100_v55  ;;  %1783 = vmatprep.mubr.bf16.mxu0 %v4100_v55  ;;  %v3553_v55 = vld [vmem:[%s4777_s6 + $0x58] sm:$0xff]  }
 0x160   :  { %1428 = vmatmul.mubr.bf16.gmra.mrb[108].mxu1 %v4098_v53  ;;  %1784 = vmatmul.mubr.bf16.gmra.mrb[108].mxu0 %v4098_v53  ;;  %v3552_v53 = vld [vmem:[%s4777_s6 + $0x88] sm:$0xff]  }
 0x161   :  { %3212 = vmatprep.mubr.bf16.mxu0 %v4112_v30  ;;  %1470 = vmatprep.mubr.bf16.mxu1 %v3633_v1 }
 0x168   :  { %1471 = vmatmul.mubr.bf16.vlgmr.msra.gmra.mrb[48].mxu1 %v4112_v30  ;;  %3213 = vmatmul.mubr.bf16.vlgmr.msra.gmra.mrb[112].mxu0 %v4110_v28  ;;  %v3555_v30 = vld [vmem:[%s4777_s6 + $0x60] sm:$0xff]  }
 0x169   :  { %1480 = vmatprep.mubr.bf16.mxu1 %v3633_v1  ;;  %3216 = vmatprep.mubr.bf16.mxu0 %v4124_v0 }
 0x16a   :  { %3025 = vmatpush3.bf16.msra.mxu0 %v3546_v63  ;;  %3245 = vmatpush3.bf16.msra.mxu1 %v3547_v38 }
 0x16b   :  { %3026 = vmatprep.subr.bf16.mxu0 %v3548_v40  ;;  %3246 = vmatprep.subr.bf16.mxu1 %v3552_v53 }
 0x16e   :  { %3027 = vmatpush3.bf16.msra.mxu0 %v3549_v17  ;;  %3247 = vmatpush3.bf16.msra.mxu1 %v3552_v53 }
 0x16f   :  { %3028 = vmatprep.subr.bf16.mxu0 %v3550_v19 }
 0x170   :  { %1481 = vmatmul.mubr.bf16.gmra.mrb[52].mxu1 %v4110_v28  ;;  %3217 = vmatmul.mubr.bf16.gmra.mrb[116].mxu0 %v4122_v60  ;;  %v3554_v28 = vld [vmem:[%s4777_s6 + $0x18] sm:$0xff]  }
 0x171   :  { %1490 = vmatprep.mubr.bf16.mxu1 %v3633_v1  ;;  %3220 = vmatprep.mubr.bf16.mxu0 %v4136_v42 }
 0x172   :  { %3029 = vmatpush3.bf16.msra.mxu0 %v3551_v47 }
 0x173   :  { %3030 = vmatprep.subr.bf16.mxu0 %v3553_v55 }
 0x176   :  { %3031 = vmatpush3.bf16.msra.mxu0 %v3554_v28 }
 0x177   :  { %3032 = vmatprep.subr.bf16.mxu0 %v3555_v30 }
 0x178   :  { %1491 = vmatmul.mubr.bf16.gmra.mrb[56].mxu1 %v4124_v0  ;;  %3221 = vmatmul.mubr.bf16.gmra.mrb[120].mxu0 %v4134_v39  ;;  %v3557_v0 = vld [vmem:[%s4777_s6 + $0x90] sm:$0xff]  }
 0x179   :  { %1500 = vmatprep.mubr.bf16.mxu1 %v3633_v1  ;;  %3224 = vmatprep.mubr.bf16.mxu0 %v4148_v21 }
 0x17a   :  { %3248 = vmatprep.subr.bf16.mxu1 %v3557_v0 }
 0x17b   :  { %3249 = vmatpush3.bf16.msra.mxu1 %v3557_v0 }
 0x180   :  { %1501 = vmatmul.mubr.bf16.gmra.mrb[60].mxu1 %v4122_v60  ;;  %3225 = vmatmul.mubr.bf16.gmra.mrb[124].mxu0 %v4146_v18  ;;  %v3556_v60 = vld [vmem:[%s4777_s6 + $0x20] sm:$0xff]  }
 0x181   :  { %1510 = vmatprep.mubr.bf16.mxu1 %v3633_v1  ;;  %3228 = vmatprep.mubr.bf16.mxu0 %v4160_v13 }
 0x182   :  { %3033 = vmatpush3.bf16.msra.mxu0 %v3556_v60 }
 0x188   :  { %1511 = vmatmul.mubr.bf16.gmra.mrb[64].mxu1 %v4136_v42  ;;  %3229 = vmatmul.mubr.bf16.gmra.mrb[128].mxu0 %v4158_v57  ;;  %v3559_v42 = vld [vmem:[%s4777_s6 + $0x28] sm:$0xff]  }
 0x189   :  { %1520 = vmatprep.mubr.bf16.mxu1 %v3633_v1  ;;  %3232 = vmatprep.mubr.bf16.mxu0 %v4172_v44 }
 0x190   :  { %1521 = vmatmul.mubr.bf16.gmra.mrb[68].mxu1 %v4134_v39  ;;  %3233 = vmatmul.mubr.bf16.gmra.mrb[132].mxu0 %v4170_v41  ;;  %v3558_v39 = vld [vmem:[%s4777_s6 + $0x68] sm:$0xff]  }
 0x191   :  { %1530 = vmatprep.mubr.bf16.mxu1 %v3633_v1  ;;  %3236 = vmatprep.mubr.bf16.mxu0 %v4184_v29 }
 0x192   :  { %3034 = vmatprep.subr.bf16.mxu0 %v3558_v39 }
 0x193   :  { %3035 = vmatpush3.bf16.msra.mxu0 %v3559_v42 }
 0x198   :  { %1531 = vmatmul.mubr.bf16.gmra.mrb[72].mxu1 %v4148_v21  ;;  %3237 = vmatmul.mubr.bf16.gmra.mrb[136].mxu0 %v4182_v25  ;;  %v3563_v21 = vld [vmem:[%s4777_s6 + $0xa0] sm:$0xff]  }
 0x199   :  { %1540 = vmatprep.mubr.bf16.mxu1 %v3633_v1  ;;  %3240 = vmatprep.mubr.bf16.mxu0 %v4194_v50 }
 0x1a0   :  { %1541 = vmatmul.mubr.bf16.gmra.mrb[76].mxu1 %v4146_v18  ;;  %3241 = vmatmul.mubr.bf16.gmra.mrb[140].mxu0 %v4192_v49  ;;  %v3560_v18 = vld [vmem:[%s4777_s6 + $0x98] sm:$0xff]  }
 0x1a1   :  { %1550 = vmatprep.mubr.bf16.mxu1 %v3633_v1  ;;  %3250 = vmatprep.subr.bf16.mxu1 %v3560_v18 }
 0x1a2   :  { %3251 = vmatpush3.bf16.msra.mxu1 %v3560_v18 }
 0x1a3   :  { %3252 = vmatprep.subr.bf16.mxu1 %v3563_v21 }
 0x1a6   :  { %3253 = vmatpush3.bf16.msra.mxu1 %v3563_v21 }
 0x1a8   :  { %1551 = vmatmul.mubr.bf16.gmra.mrb[80].mxu1 %v4160_v13  ;;  %v3561_v13 = vld [vmem:[%s4777_s6 + $0x70] sm:$0xff]  }
 0x1a9   :  { %1560 = vmatprep.mubr.bf16.mxu1 %v3633_v1  ;;  %3036 = vmatprep.subr.bf16.mxu0 %v3561_v13 }
 0x1aa   :  { %3037 = vmatpush3.bf16.msra.mxu0 %v3562_v51 }
 0x1b0   :  { %1561 = vmatmul.mubr.bf16.gmra.mrb[84].mxu1 %v4158_v57  ;;  %v3564_v57 = vld [vmem:[%s4777_s6 + $0xa8] sm:$0xff]  }
 0x1b1   :  { %1570 = vmatprep.mubr.bf16.mxu1 %v3633_v1  ;;  %3254 = vmatprep.subr.bf16.mxu1 %v3564_v57 }
 0x1b2   :  { %3255 = vmatpush3.bf16.msra.mxu1 %v3564_v57 }
 0x1b3   :  { %3256 = vmatprep.subr.bf16.mxu1 %v3567_v56 }
 0x1b6   :  { %3257 = vmatpush3.bf16.msra.mxu1 %v3567_v56 }
 0x1b7   :  { %3258 = vmatprep.subr.bf16.mxu1 %v3568_v3 }
 0x1b8   :  { %1571 = vmatmul.mubr.bf16.gmra.mrb[88].mxu1 %v4172_v44  ;;  %v3565_v44 = vld [vmem:[%s4777_s6 + $0x78] sm:$0xff]  }
 0x1b9   :  { %1580 = vmatprep.mubr.bf16.mxu1 %v3633_v1  ;;  %3038 = vmatprep.subr.bf16.mxu0 %v3565_v44 }
 0x1ba   :  { %3039 = vmatpush3.bf16.msra.mxu0 %v3566_v4  ;;  %3259 = vmatpush3.bf16.msra.mxu1 %v3568_v3 }
 0x1bb   :  { %v2904_v52 = vpop.f32.mrb[48].mxu0 }
 0x1bc   :  { %v2905_v54 = vpop.f32.mrb[49].mxu0 }
 0x1bd   :  { %v4312_v58 = vadd.f32 %v2905_v54, %v2904_v52  ;;  %v2907_v59 = vpop.f32.mrb[50].mxu0 }
 0x1be   :  { %v2908_v62 = vpop.f32.mrb[51].mxu0 }
 0x1bf   :  { %v4314_v2 = vadd.f32 %v2908_v62, %v2907_v59 }
 0x1c0   :  { %1581 = vmatmul.mubr.bf16.gmra.mrb[92].mxu1 %v4170_v41 }
 0x1c1   :  { %1590 = vmatprep.mubr.bf16.mxu1 %v3633_v1 }
 0x1c3   :  { %v2910_v5 = vpop.f32.mrb[52].mxu0 }
 0x1c4   :  { %v2911_v41 = vpop.f32.mrb[53].mxu0 }
 0x1c5   :  { %v4327_v6 = vadd.f32 %v2911_v41, %v2910_v5  ;;  %v2913_v7 = vpop.f32.mrb[54].mxu0 }
 0x1c6   :  { %v2914_v8 = vpop.f32.mrb[55].mxu0 }
 0x1c7   :  { %v4329_v9 = vadd.f32 %v2914_v8, %v2913_v7 }
 0x1c8   :  { %1591 = vmatmul.mubr.bf16.gmra.mrb[96].mxu1 %v4184_v29 }
 0x1c9   :  { %1600 = vmatprep.mubr.bf16.mxu1 %v3633_v1 }
 0x1cb   :  { %v2916_v10 = vpop.f32.mrb[56].mxu0 }
 0x1cc   :  { %v2917_v20 = vpop.f32.mrb[57].mxu0 }
 0x1cd   :  { %v4333_v22 = vadd.f32 %v2917_v20, %v2916_v10  ;;  %v2919_v23 = vpop.f32.mrb[58].mxu0 }
 0x1ce   :  { %v2920_v24 = vpop.f32.mrb[59].mxu0 }
 0x1cf   :  { %v4335_v27 = vadd.f32 %v2920_v24, %v2919_v23 }
 0x1d0   :  { %1601 = vmatmul.mubr.bf16.gmra.mrb[100].mxu1 %v4182_v25 }
 0x1d1   :  { %1610 = vmatprep.mubr.bf16.mxu1 %v3633_v1 }
 0x1d3   :  { %v2922_v15 = vpop.f32.mrb[60].mxu0 }
 0x1d4   :  { %v2923_v31 = vpop.f32.mrb[61].mxu0 }
 0x1d5   :  { %v4339_v32 = vadd.f32 %v2923_v31, %v2922_v15  ;;  %v2925_v33 = vpop.f32.mrb[62].mxu0 }
 0x1d6   :  { %v2926_v29 = vpop.f32.mrb[63].mxu0 }
 0x1d7   :  { %v4341_v34 = vadd.f32 %v2926_v29, %v2925_v33 }
 0x1d8   :  { %1611 = vmatmul.mubr.bf16.gmra.mrb[104].mxu1 %v4194_v50 }
 0x1d9   :  { %1620 = vmatprep.mubr.bf16.mxu1 %v3633_v1 }
 0x1db   :  { %v2928_v35 = vpop.f32.mrb[64].mxu0 }
 0x1dc   :  { %v2929_v16 = vpop.f32.mrb[65].mxu0 }
 0x1dd   :  { %v4345_v36 = vadd.f32 %v2929_v16, %v2928_v35  ;;  %v2931_v37 = vpop.f32.mrb[66].mxu0 }
 0x1de   :  { %v2932_v25 = vpop.f32.mrb[67].mxu0 }
 0x1df   :  { %v4347_v43 = vadd.f32 %v2932_v25, %v2931_v37 }
 0x1e0   :  { %1621 = vmatmul.mubr.bf16.gmra.mrb[108].mxu1 %v4192_v49 }
 0x1e3   :  { %v2934_v45 = vpop.f32.mrb[68].mxu0 }
 0x1e4   :  { %v2935_v46 = vpop.f32.mrb[69].mxu0 }
 0x1e5   :  { %v4350_v48 = vadd.f32 %v2935_v46, %v2934_v45  ;;  %v2937_v61 = vpop.f32.mrb[70].mxu0 }
 0x1e6   :  { %v2938_v63 = vpop.f32.mrb[71].mxu0 }
 0x1e7   :  { %v4352_v38 = vadd.f32 %v2938_v63, %v2937_v61 }
 0x1eb   :  { %v2940_v50 = vpop.f32.mrb[72].mxu0 }
 0x1ec   :  { %v2941_v1 = vpop.f32.mrb[73].mxu0 }
 0x1ed   :  { %v4354_v40 = vadd.f32 %v2941_v1, %v2940_v50  ;;  %v2943_v17 = vpop.f32.mrb[74].mxu0 }
 0x1ee   :  { %v2944_v19 = vpop.f32.mrb[75].mxu0 }
 0x1ef   :  { %v4356_v47 = vadd.f32 %v2944_v19, %v2943_v17 }
 0x1f3   :  { %v2946_v53 = vpop.f32.mrb[76].mxu0 }
 0x1f4   :  { %v2947_v55 = vpop.f32.mrb[77].mxu0 }
 0x1f5   :  { %v4358_v28 = vadd.f32 %v2947_v55, %v2946_v53  ;;  %v2949_v49 = vpop.f32.mrb[78].mxu0 }
 0x1f6   :  { %v2950_v30 = vpop.f32.mrb[79].mxu0 }
 0x1f7   :  { %v4360_v60 = vadd.f32 %v2950_v30, %v2949_v49 }
 0x1fb   :  { %v2952_v0 = vpop.f32.mrb[80].mxu0 }
 0x1fc   :  { %v2953_v39 = vpop.f32.mrb[81].mxu0 }
 0x1fd   :  { %v4362_v42 = vadd.f32 %v2953_v39, %v2952_v0  ;;  %v2955_v18 = vpop.f32.mrb[82].mxu0  ;;  %v844_v0 = vld [vmem:[%s4778_s5] sm:$0x7] }
 0x1fe   :  { %v2956_v21 = vpop.f32.mrb[83].mxu0 }
 0x1ff   :  { %v4364_v13 = vadd.f32 %v2956_v21, %v2955_v18 }
 0x203   :  { %v2958_v51 = vpop.f32.mrb[84].mxu0 }
 0x204   :  { %v2959_v57 = vpop.f32.mrb[85].mxu0 }
 0x205   :  { %v4366_v52 = vadd.f32 %v2959_v57, %v2958_v51  ;;  %v2961_v54 = vpop.f32.mrb[86].mxu0  ;;  %v4399_v57 = vrot.slane %v844_v0, %v84_v26 }
 0x206   :  { %v2962_v56 = vpop.f32.mrb[87].mxu0 }
 0x207   :  { %v4368_v59 = vadd.f32 %v2962_v56, %v2961_v54  ;;  %v4403_v54 = vrot.slane %v844_v0, %v76_v12  ;;  %v4407_v56 = vrot.slane %v844_v0, %v80_v14  ;;  %v1677_v12 = vadd.f32 %v4329_v9, %v4399_v57 }
 0x20b   :  { %v2964_v62 = vpop.f32.mrb[88].mxu0 }
 0x20c   :  { %v2965_v44 = vpop.f32.mrb[89].mxu0 }
 0x20d   :  { %v4370_v3 = vadd.f32 %v2965_v44, %v2964_v62  ;;  %v2967_v4 = vpop.f32.mrb[90].mxu0  ;;  %v1674_v62 = vadd.f32 %v4327_v6, %v4399_v57  ;;  %v1669_v6 = vadd.f32 %v4314_v2, %v4399_v57  ;;  %v1690_v2 = vadd.f32 %v4339_v32, %v4399_v57 }
 0x20e   :  { %v2968_v5 = vpop.f32.mrb[91].mxu0 }
 0x20f   :  { %v4372_v41 = vadd.f32 %v2968_v5, %v2967_v4  ;;  %v1666_v5 = vadd.f32 %v4312_v58, %v4399_v57 }
 0x213   :  { %v2970_v7 = vpop.f32.mrb[92].mxu0 }
 0x214   :  { %v2971_v8 = vpop.f32.mrb[93].mxu0 }
 0x215   :  { %v4374_v10 = vadd.f32 %v2971_v8, %v2970_v7  ;;  %v2973_v20 = vpop.f32.mrb[94].mxu0 }
 0x216   :  { %v2974_v23 = vpop.f32.mrb[95].mxu0 }
 0x217   :  { %v4376_v24 = vadd.f32 %v2974_v23, %v2973_v20 }
 0x21b   :  { %v2976_v15 = vpop.f32.mrb[96].mxu0 }
 0x21c   :  { %v2977_v31 = vpop.f32.mrb[97].mxu0 }
 0x21d   :  { %v4378_v33 = vadd.f32 %v2977_v31, %v2976_v15  ;;  %v2979_v29 = vpop.f32.mrb[98].mxu0 }
 0x21e   :  { %v2980_v35 = vpop.f32.mrb[99].mxu0 }
 0x21f   :  { %v4380_v16 = vadd.f32 %v2980_v35, %v2979_v29 }
 0x223   :  { %v2982_v37 = vpop.f32.mrb[100].mxu0 }
 0x224   :  { %v2983_v25 = vpop.f32.mrb[101].mxu0 }
 0x225   :  { %v4382_v45 = vadd.f32 %v2983_v25, %v2982_v37  ;;  %v2985_v46 = vpop.f32.mrb[102].mxu0 }
 0x226   :  { %v2986_v61 = vpop.f32.mrb[103].mxu0 }
 0x227   :  { %v4384_v63 = vadd.f32 %v2986_v61, %v2985_v46 }
 0x22b   :  { %v2988_v50 = vpop.f32.mrb[104].mxu0 }
 0x22c   :  { %v2989_v1 = vpop.f32.mrb[105].mxu0 }
 0x22d   :  { %v4386_v17 = vadd.f32 %v2989_v1, %v2988_v50  ;;  %v2991_v19 = vpop.f32.mrb[106].mxu0 }
 0x22e   :  { %v2992_v53 = vpop.f32.mrb[107].mxu0 }
 0x22f   :  { %v4388_v55 = vadd.f32 %v2992_v53, %v2991_v19 }
 0x233   :  { %v2994_v49 = vpop.f32.mrb[108].mxu0 }
 0x234   :  { %v2995_v30 = vpop.f32.mrb[109].mxu0 }
 0x235   :  { %v4393_v39 = vadd.f32 %v2995_v30, %v2994_v49  ;;  %v2997_v18 = vpop.f32.mrb[110].mxu0 }
 0x236   :  { %v2998_v21 = vpop.f32.mrb[111].mxu0 }
 0x237   :  { %v4395_v51 = vadd.f32 %v2998_v21, %v2997_v18 }
 0x23b   :  { %v1472_v44 = vpop.f32.mrb[48].mxu1  ;;  %v3214_v4 = vpop.f32.mrb[112].mxu0 }
 0x23c   :  { %v3296_v7 = vadd.f32 %v1472_v44, %v4403_v54  ;;  %v1835_v26 = vadd.f32 %v3214_v4, %v1674_v62  ;;  %v1474_v8 = vpop.f32.mrb[49].mxu1  ;;  %v1826_v20 = vpop.f32.mrb[113].mxu0  ;;  %v1682_v4 = vadd.f32 %v4333_v22, %v4399_v57 }
 0x23d   :  { %v3297_v11 = vadd.f32 %v1474_v8, %v4407_v56  ;;  %v1827_v14 = vadd.f32 %v1826_v20, %v1666_v5  ;;  %v1476_v23 = vpop.f32.mrb[50].mxu1  ;;  %v3215_v15 = vpop.f32.mrb[114].mxu0  ;;  %v1693_v20 = vadd.f32 %v4341_v34, %v4399_v57 }
 0x23e   :  { %v3298_v31 = vadd.f32 %v1476_v23, %v4403_v54  ;;  %v1838_v29 = vadd.f32 %v3215_v15, %v1677_v12  ;;  %v1478_v58 = vpop.f32.mrb[51].mxu1  ;;  %v1829_v35 = vpop.f32.mrb[115].mxu0  ;;  %v1953_v46 = vmax.f32 %v3296_v7, 0.0  ;;  %v1961_v61 = vmax.f32 %v1835_v26, 0.0 }
 0x23f   :  { %v3299_v37 = vadd.f32 %v1478_v58, %v4407_v56  ;;  %v1830_v25 = vadd.f32 %v1829_v35, %v1669_v6  ;;  %v1954_v1 = vmax.f32 %v3297_v11, 0.0  ;;  %v1955_v19 = vmax.f32 %v1827_v14, 0.0 }
 0x240   :  { %v1956_v50 = vmax.f32 %v3298_v31, 0.0  ;;  %v1964_v9 = vmax.f32 %v1838_v29, 0.0  ;;  %v1685_v23 = vadd.f32 %v4335_v27, %v4399_v57 }
 0x241   :  { %v1957_v53 = vmax.f32 %v3299_v37, 0.0  ;;  %v1958_v49 = vmax.f32 %v1830_v25, 0.0 }
 0x242   :  { %v2049_v30 = vpack.c.bf16 %v1956_v50, %v1953_v46  ;;  %v2054_v0 = vpack.c.bf16 %v1964_v9, %v1961_v61 }
 0x243   :  { %v2050_v18 = vpack.c.bf16 %v1957_v53, %v1954_v1  ;;  %v2051_v21 = vpack.c.bf16 %v1958_v49, %v1955_v19  ;;  %v1482_v62 = vpop.f32.mrb[52].mxu1  ;;  %v3218_v44 = vpop.f32.mrb[116].mxu0  ;;  %v1706_v19 = vadd.f32 %v4350_v48, %v4399_v57 }
 0x244   :  { %v3300_v5 = vadd.f32 %v1482_v62, %v4403_v54  ;;  %v1851_v7 = vadd.f32 %v3218_v44, %v1690_v2  ;;  %v1484_v26 = vpop.f32.mrb[53].mxu1  ;;  %v1842_v8 = vpop.f32.mrb[117].mxu0  ;;  %v1698_v2 = vadd.f32 %v4345_v36, %v4399_v57 }
 0x245   :  { %v3301_v12 = vadd.f32 %v1484_v26, %v4407_v56  ;;  %v1843_v11 = vadd.f32 %v1842_v8, %v1682_v4  ;;  %v1486_v14 = vpop.f32.mrb[54].mxu1  ;;  %v3219_v32 = vpop.f32.mrb[118].mxu0  ;;  %2328 = vmatprep.mubr.bf16.mxu0 %v2050_v18  ;;  %3260 = vmatprep.mubr.bf16.mxu1 %v2051_v21  ;;  %v1709_v4 = vadd.f32 %v4352_v38, %v4399_v57 }
 0x246   :  { %v3302_v22 = vadd.f32 %v1486_v14, %v4403_v54  ;;  %v1854_v15 = vadd.f32 %v3219_v32, %v1693_v20  ;;  %v1488_v6 = vpop.f32.mrb[55].mxu1  ;;  %v1845_v31 = vpop.f32.mrb[119].mxu0  ;;  %2329 = vmatmul.mubr.bf16.vlgmr.msra.gmra.mrb[144].mxu0 %v2049_v30  ;;  %3261 = vmatmul.mubr.bf16.vlgmr.msra.gmra.mrb[112].mxu1 %v2054_v0  ;;  %v1959_v58 = vmax.f32 %v3300_v5, 0.0  ;;  %v1973_v35 = vmax.f32 %v1851_v7, 0.0 }
 0x247   :  { %v3303_v29 = vadd.f32 %v1488_v6, %v4407_v56  ;;  %v1846_v34 = vadd.f32 %v1845_v31, %v1685_v23  ;;  %v1960_v46 = vmax.f32 %v3301_v12, 0.0  ;;  %v1967_v61 = vmax.f32 %v1843_v11, 0.0 }
 0x248   :  { %v1962_v37 = vmax.f32 %v3302_v22, 0.0  ;;  %v1976_v25 = vmax.f32 %v1854_v15, 0.0  ;;  %v1701_v8 = vadd.f32 %v4347_v43, %v4399_v57 }
 0x249   :  { %v1963_v50 = vmax.f32 %v3303_v29, 0.0  ;;  %v1970_v9 = vmax.f32 %v1846_v34, 0.0 }
 0x24a   :  { %v2052_v1 = vpack.c.bf16 %v1962_v37, %v1959_v58  ;;  %v2060_v27 = vpack.c.bf16 %v1976_v25, %v1973_v35  ;;  %v1722_v35 = vadd.f32 %v4358_v28, %v4399_v57 }
 0x24b   :  { %v2053_v53 = vpack.c.bf16 %v1963_v50, %v1960_v46  ;;  %v2057_v49 = vpack.c.bf16 %v1970_v9, %v1967_v61  ;;  %v1492_v30 = vpop.f32.mrb[56].mxu1  ;;  %v3222_v0 = vpop.f32.mrb[120].mxu0  ;;  %v1714_v50 = vadd.f32 %v4354_v40, %v4399_v57 }
 0x24c   :  { %v3304_v18 = vadd.f32 %v1492_v30, %v4403_v54  ;;  %v1867_v21 = vadd.f32 %v3222_v0, %v1706_v19  ;;  %v1494_v62 = vpop.f32.mrb[57].mxu1  ;;  %v1858_v44 = vpop.f32.mrb[121].mxu0 }
 0x24d   :  { %v3305_v5 = vadd.f32 %v1494_v62, %v4407_v56  ;;  %v1859_v7 = vadd.f32 %v1858_v44, %v1698_v2  ;;  %v1496_v26 = vpop.f32.mrb[58].mxu1  ;;  %v3223_v48 = vpop.f32.mrb[122].mxu0  ;;  %2336 = vmatprep.mubr.bf16.mxu0 %v2053_v53  ;;  %3264 = vmatprep.mubr.bf16.mxu1 %v2057_v49  ;;  %v1725_v53 = vadd.f32 %v4360_v60, %v4399_v57 }
 0x24e   :  { %v3306_v36 = vadd.f32 %v1496_v26, %v4403_v54  ;;  %v1870_v20 = vadd.f32 %v3223_v48, %v1709_v4  ;;  %v1498_v12 = vpop.f32.mrb[59].mxu1  ;;  %v1861_v11 = vpop.f32.mrb[123].mxu0  ;;  %2337 = vmatmul.mubr.bf16.gmra.mrb[148].mxu0 %v2052_v1  ;;  %3265 = vmatmul.mubr.bf16.gmra.mrb[116].mxu1 %v2060_v27  ;;  %v1965_v32 = vmax.f32 %v3304_v18, 0.0  ;;  %v1985_v23 = vmax.f32 %v1867_v21, 0.0 }
 0x24f   :  { %v3307_v14 = vadd.f32 %v1498_v12, %v4407_v56  ;;  %v1862_v38 = vadd.f32 %v1861_v11, %v1701_v8  ;;  %v1966_v6 = vmax.f32 %v3305_v5, 0.0  ;;  %v1979_v31 = vmax.f32 %v1859_v7, 0.0 }
 0x250   :  { %v1968_v22 = vmax.f32 %v3306_v36, 0.0  ;;  %v1988_v15 = vmax.f32 %v1870_v20, 0.0  ;;  %v1717_v2 = vadd.f32 %v4356_v47, %v4399_v57  ;;  %v1738_v11 = vadd.f32 %v4366_v52, %v4399_v57 }
 0x251   :  { %v1969_v29 = vmax.f32 %v3307_v14, 0.0  ;;  %v1982_v34 = vmax.f32 %v1862_v38, 0.0 }
 0x252   :  { %v2055_v58 = vpack.c.bf16 %v1968_v22, %v1965_v32  ;;  %v2066_v43 = vpack.c.bf16 %v1988_v15, %v1985_v23  ;;  %v1730_v22 = vadd.f32 %v4362_v42, %v4399_v57 }
 0x253   :  { %v2056_v37 = vpack.c.bf16 %v1969_v29, %v1966_v6  ;;  %v2063_v25 = vpack.c.bf16 %v1982_v34, %v1979_v31  ;;  %v1502_v46 = vpop.f32.mrb[60].mxu1  ;;  %v3226_v61 = vpop.f32.mrb[124].mxu0  ;;  %v1741_v34 = vadd.f32 %v4368_v59, %v4399_v57 }
 0x254   :  { %v3308_v9 = vadd.f32 %v1502_v46, %v4403_v54  ;;  %v1883_v1 = vadd.f32 %v3226_v61, %v1722_v35  ;;  %v1504_v27 = vpop.f32.mrb[61].mxu1  ;;  %v1874_v19 = vpop.f32.mrb[125].mxu0 }
 0x255   :  { %v3309_v49 = vadd.f32 %v1504_v27, %v4407_v56  ;;  %v1875_v30 = vadd.f32 %v1874_v19, %v1714_v50  ;;  %v1506_v0 = vpop.f32.mrb[62].mxu1  ;;  %v3227_v28 = vpop.f32.mrb[126].mxu0  ;;  %2344 = vmatprep.mubr.bf16.mxu0 %v2056_v37  ;;  %3268 = vmatprep.mubr.bf16.mxu1 %v2063_v25  ;;  %v1733_v37 = vadd.f32 %v4364_v13, %v4399_v57 }
 0x256   :  { %v3310_v40 = vadd.f32 %v1506_v0, %v4403_v54  ;;  %v1886_v18 = vadd.f32 %v3227_v28, %v1725_v53  ;;  %v1508_v21 = vpop.f32.mrb[63].mxu1  ;;  %v1877_v62 = vpop.f32.mrb[127].mxu0  ;;  %2345 = vmatmul.mubr.bf16.gmra.mrb[152].mxu0 %v2055_v58  ;;  %3269 = vmatmul.mubr.bf16.gmra.mrb[120].mxu1 %v2066_v43  ;;  %v1971_v4 = vmax.f32 %v3308_v9, 0.0  ;;  %v1997_v5 = vmax.f32 %v1883_v1, 0.0 }
 0x257   :  { %v3311_v44 = vadd.f32 %v1508_v21, %v4407_v56  ;;  %v1878_v60 = vadd.f32 %v1877_v62, %v1717_v2  ;;  %v1972_v48 = vmax.f32 %v3309_v49, 0.0  ;;  %v1991_v8 = vmax.f32 %v1875_v30, 0.0 }
 0x258   :  { %v1974_v7 = vmax.f32 %v3310_v40, 0.0  ;;  %v2000_v26 = vmax.f32 %v1886_v18, 0.0  ;;  %v1754_v2 = vadd.f32 %v4374_v10, %v4399_v57 }
 0x259   :  { %v1975_v36 = vmax.f32 %v3311_v44, 0.0  ;;  %v1994_v20 = vmax.f32 %v1878_v60, 0.0  ;;  %v1746_v44 = vadd.f32 %v4370_v3, %v4399_v57 }
 0x25a   :  { %v2058_v12 = vpack.c.bf16 %v1974_v7, %v1971_v4  ;;  %v2072_v47 = vpack.c.bf16 %v2000_v26, %v1997_v5  ;;  %v1757_v26 = vadd.f32 %v4376_v24, %v4399_v57 }
 0x25b   :  { %v2059_v14 = vpack.c.bf16 %v1975_v36, %v1972_v48  ;;  %v2069_v38 = vpack.c.bf16 %v1994_v20, %v1991_v8  ;;  %v1512_v32 = vpop.f32.mrb[64].mxu1  ;;  %v3230_v23 = vpop.f32.mrb[128].mxu0  ;;  %v1749_v20 = vadd.f32 %v4372_v41, %v4399_v57 }
 0x25c   :  { %v3312_v15 = vadd.f32 %v1512_v32, %v4403_v54  ;;  %v1899_v6 = vadd.f32 %v3230_v23, %v1738_v11  ;;  %v1514_v31 = vpop.f32.mrb[65].mxu1  ;;  %v1890_v29 = vpop.f32.mrb[129].mxu0 }
 0x25d   :  { %v3313_v58 = vadd.f32 %v1514_v31, %v4407_v56  ;;  %v1891_v43 = vadd.f32 %v1890_v29, %v1730_v22  ;;  %v1516_v35 = vpop.f32.mrb[66].mxu1  ;;  %v3231_v52 = vpop.f32.mrb[130].mxu0  ;;  %2352 = vmatprep.mubr.bf16.mxu0 %v2059_v14  ;;  %3272 = vmatprep.mubr.bf16.mxu1 %v2069_v38 }
 0x25e   :  { %v3314_v42 = vadd.f32 %v1516_v35, %v4403_v54  ;;  %v1902_v25 = vadd.f32 %v3231_v52, %v1741_v34  ;;  %v1518_v46 = vpop.f32.mrb[67].mxu1  ;;  %v1893_v61 = vpop.f32.mrb[131].mxu0  ;;  %2353 = vmatmul.mubr.bf16.gmra.mrb[156].mxu0 %v2058_v12  ;;  %3273 = vmatmul.mubr.bf16.gmra.mrb[124].mxu1 %v2072_v47  ;;  %v1977_v9 = vmax.f32 %v3312_v15, 0.0  ;;  %v2009_v1 = vmax.f32 %v1899_v6, 0.0 }
 0x25f   :  { %v3315_v50 = vadd.f32 %v1518_v46, %v4407_v56  ;;  %v1894_v59 = vadd.f32 %v1893_v61, %v1733_v37  ;;  %v1978_v53 = vmax.f32 %v3313_v58, 0.0  ;;  %v2003_v49 = vmax.f32 %v1891_v43, 0.0 }
 0x260   :  { %v1980_v27 = vmax.f32 %v3314_v42, 0.0  ;;  %v2012_v19 = vmax.f32 %v1902_v25, 0.0  ;;  %v1770_v58 = vadd.f32 %v4382_v45, %v4399_v57  ;;  %v1762_v42 = vadd.f32 %v4378_v33, %v4399_v57 }
 0x261   :  { %v1981_v30 = vmax.f32 %v3315_v50, 0.0  ;;  %v2006_v0 = vmax.f32 %v1894_v59, 0.0  ;;  %v1773_v59 = vadd.f32 %v4384_v63, %v4399_v57 }
 0x262   :  { %v2061_v28 = vpack.c.bf16 %v1980_v27, %v1977_v9  ;;  %v2078_v13 = vpack.c.bf16 %v2012_v19, %v2009_v1  ;;  %v1765_v19 = vadd.f32 %v4380_v16, %v4399_v57 }
 0x263   :  { %v2062_v40 = vpack.c.bf16 %v1981_v30, %v1978_v53  ;;  %v2075_v18 = vpack.c.bf16 %v2006_v0, %v2003_v49  ;;  %v1522_v21 = vpop.f32.mrb[68].mxu1  ;;  %v3234_v62 = vpop.f32.mrb[132].mxu0 }
 0x264   :  { %v3316_v60 = vadd.f32 %v1522_v21, %v4403_v54  ;;  %v1915_v4 = vadd.f32 %v3234_v62, %v1754_v2  ;;  %v1524_v5 = vpop.f32.mrb[69].mxu1  ;;  %v1906_v7 = vpop.f32.mrb[133].mxu0 }
 0x265   :  { %v3317_v48 = vadd.f32 %v1524_v5, %v4407_v56  ;;  %v1907_v8 = vadd.f32 %v1906_v7, %v1746_v44  ;;  %v1526_v36 = vpop.f32.mrb[70].mxu1  ;;  %v3235_v10 = vpop.f32.mrb[134].mxu0  ;;  %2360 = vmatprep.mubr.bf16.mxu0 %v2062_v40  ;;  %3276 = vmatprep.mubr.bf16.mxu1 %v2075_v18 }
 0x266   :  { %v3318_v3 = vadd.f32 %v1526_v36, %v4403_v54  ;;  %v1918_v12 = vadd.f32 %v3235_v10, %v1757_v26  ;;  %v1528_v47 = vpop.f32.mrb[71].mxu1  ;;  %v1909_v11 = vpop.f32.mrb[135].mxu0  ;;  %2361 = vmatmul.mubr.bf16.gmra.mrb[160].mxu0 %v2061_v28  ;;  %3277 = vmatmul.mubr.bf16.gmra.mrb[128].mxu1 %v2078_v13  ;;  %v1983_v38 = vmax.f32 %v3316_v60, 0.0  ;;  %v2021_v32 = vmax.f32 %v1915_v4, 0.0 }
 0x267   :  { %v3319_v14 = vadd.f32 %v1528_v47, %v4407_v56  ;;  %v1910_v24 = vadd.f32 %v1909_v11, %v1749_v20  ;;  %v1984_v15 = vmax.f32 %v3317_v48, 0.0  ;;  %v2015_v6 = vmax.f32 %v1907_v8, 0.0 }
 0x268   :  { %v1986_v23 = vmax.f32 %v3318_v3, 0.0  ;;  %v2024_v22 = vmax.f32 %v1918_v12, 0.0  ;;  %v1786_v4 = vadd.f32 %v4393_v39, %v4399_v57  ;;  %v1778_v8 = vadd.f32 %v4386_v17, %v4399_v57 }
 0x269   :  { %v1987_v31 = vmax.f32 %v3319_v14, 0.0  ;;  %v2018_v29 = vmax.f32 %v1910_v24, 0.0  ;;  %v1789_v12 = vadd.f32 %v4395_v51, %v4399_v57  ;;  %v1781_v24 = vadd.f32 %v4388_v55, %v4399_v57 }
 0x26a   :  { %v2064_v34 = vpack.c.bf16 %v1986_v23, %v1983_v38  ;;  %v2084_v41 = vpack.c.bf16 %v2024_v22, %v2021_v32 }
 0x26b   :  { %v2065_v43 = vpack.c.bf16 %v1987_v31, %v1984_v15  ;;  %v2081_v35 = vpack.c.bf16 %v2018_v29, %v2015_v6  ;;  %v1532_v52 = vpop.f32.mrb[72].mxu1  ;;  %v3238_v37 = vpop.f32.mrb[136].mxu0 }
 0x26c   :  { %v3320_v25 = vadd.f32 %v1532_v52, %v4403_v54  ;;  %v1931_v46 = vadd.f32 %v3238_v37, %v1770_v58  ;;  %v1534_v61 = vpop.f32.mrb[73].mxu1  ;;  %v1922_v50 = vpop.f32.mrb[137].mxu0 }
 0x26d   :  { %v3321_v9 = vadd.f32 %v1534_v61, %v4407_v56  ;;  %v1923_v1 = vadd.f32 %v1922_v50, %v1762_v42  ;;  %v1536_v27 = vpop.f32.mrb[74].mxu1  ;;  %v3239_v45 = vpop.f32.mrb[138].mxu0  ;;  %2368 = vmatprep.mubr.bf16.mxu0 %v2065_v43  ;;  %3280 = vmatprep.mubr.bf16.mxu1 %v2081_v35 }
 0x26e   :  { %v3322_v33 = vadd.f32 %v1536_v27, %v4403_v54  ;;  %v1934_v53 = vadd.f32 %v3239_v45, %v1773_v59  ;;  %v1538_v49 = vpop.f32.mrb[75].mxu1  ;;  %v1925_v30 = vpop.f32.mrb[139].mxu0  ;;  %2369 = vmatmul.mubr.bf16.gmra.mrb[164].mxu0 %v2064_v34  ;;  %3281 = vmatmul.mubr.bf16.gmra.mrb[132].mxu1 %v2084_v41  ;;  %v1989_v28 = vmax.f32 %v3320_v25, 0.0  ;;  %v2033_v13 = vmax.f32 %v1931_v46, 0.0 }
 0x26f   :  { %v3323_v0 = vadd.f32 %v1538_v49, %v4407_v56  ;;  %v1926_v63 = vadd.f32 %v1925_v30, %v1765_v19  ;;  %v1990_v18 = vmax.f32 %v3321_v9, 0.0  ;;  %v2027_v21 = vmax.f32 %v1923_v1, 0.0 }
 0x270   :  { %v1992_v2 = vmax.f32 %v3322_v33, 0.0  ;;  %v2036_v40 = vmax.f32 %v1934_v53, 0.0 }
 0x271   :  { %v1993_v62 = vmax.f32 %v3323_v0, 0.0  ;;  %v2030_v44 = vmax.f32 %v1926_v63, 0.0 }
 0x272   :  { %v2067_v60 = vpack.c.bf16 %v1992_v2, %v1989_v28  ;;  %v2090_v16 = vpack.c.bf16 %v2036_v40, %v2033_v13 }
 0x273   :  { %v2068_v5 = vpack.c.bf16 %v1993_v62, %v1990_v18  ;;  %v2087_v7 = vpack.c.bf16 %v2030_v44, %v2027_v21  ;;  %v1542_v26 = vpop.f32.mrb[76].mxu1  ;;  %v3242_v48 = vpop.f32.mrb[140].mxu0 }
 0x274   :  { %v3324_v36 = vadd.f32 %v1542_v26, %v4403_v54  ;;  %v1947_v10 = vadd.f32 %v3242_v48, %v1786_v4  ;;  %v1544_v20 = vpop.f32.mrb[77].mxu1  ;;  %v1938_v3 = vpop.f32.mrb[141].mxu0 }
 0x275   :  { %v3325_v47 = vadd.f32 %v1544_v20, %v4407_v56  ;;  %v1939_v11 = vadd.f32 %v1938_v3, %v1778_v8  ;;  %v1546_v14 = vpop.f32.mrb[78].mxu1  ;;  %v3243_v39 = vpop.f32.mrb[142].mxu0  ;;  %2376 = vmatprep.mubr.bf16.mxu0 %v2068_v5  ;;  %3284 = vmatprep.mubr.bf16.mxu1 %v2087_v7 }
 0x276   :  { %v3326_v17 = vadd.f32 %v1546_v14, %v4403_v54  ;;  %v1950_v38 = vadd.f32 %v3243_v39, %v1789_v12  ;;  %v1548_v32 = vpop.f32.mrb[79].mxu1  ;;  %v1941_v23 = vpop.f32.mrb[143].mxu0  ;;  %2377 = vmatmul.mubr.bf16.gmra.mrb[168].mxu0 %v2067_v60  ;;  %3285 = vmatmul.mubr.bf16.gmra.mrb[136].mxu1 %v2090_v16  ;;  %v1995_v15 = vmax.f32 %v3324_v36, 0.0  ;;  %v2045_v6 = vmax.f32 %v1947_v10, 0.0 }
 0x277   :  { %v3327_v22 = vadd.f32 %v1548_v32, %v4407_v56  ;;  %v1942_v51 = vadd.f32 %v1941_v23, %v1781_v24  ;;  %v1996_v34 = vmax.f32 %v3325_v47, 0.0  ;;  %v2039_v41 = vmax.f32 %v1939_v11, 0.0 }
 0x278   :  { %v1998_v31 = vmax.f32 %v3326_v17, 0.0  ;;  %v2048_v29 = vmax.f32 %v1950_v38, 0.0 }
 0x279   :  { %v1999_v58 = vmax.f32 %v3327_v22, 0.0  ;;  %v2042_v43 = vmax.f32 %v1942_v51, 0.0 }
 0x27a   :  { %v2070_v35 = vpack.c.bf16 %v1998_v31, %v1995_v15  ;;  %v2096_v55 = vpack.c.bf16 %v2048_v29, %v2045_v6 }
 0x27b   :  { %v2071_v57 = vpack.c.bf16 %v1999_v58, %v1996_v34  ;;  %v2093_v52 = vpack.c.bf16 %v2042_v43, %v2039_v41  ;;  %v1552_v37 = vpop.f32.mrb[80].mxu1 }
 0x27c   :  { %v3328_v42 = vadd.f32 %v1552_v37, %v4403_v54  ;;  %v1554_v25 = vpop.f32.mrb[81].mxu1 }
 0x27d   :  { %v3329_v46 = vadd.f32 %v1554_v25, %v4407_v56  ;;  %v1556_v61 = vpop.f32.mrb[82].mxu1  ;;  %2384 = vmatprep.mubr.bf16.mxu0 %v2071_v57  ;;  %3288 = vmatprep.mubr.bf16.mxu1 %v2093_v52 }
 0x27e   :  { %v3330_v50 = vadd.f32 %v1556_v61, %v4403_v54  ;;  %v1558_v59 = vpop.f32.mrb[83].mxu1  ;;  %2385 = vmatmul.mubr.bf16.gmra.mrb[172].mxu0 %v2070_v35  ;;  %3289 = vmatmul.mubr.bf16.gmra.mrb[140].mxu1 %v2096_v55  ;;  %v2001_v1 = vmax.f32 %v3328_v42, 0.0 }
 0x27f   :  { %v3331_v9 = vadd.f32 %v1558_v59, %v4407_v56  ;;  %v2002_v45 = vmax.f32 %v3329_v46, 0.0 }
 0x280   :  { %v2004_v27 = vmax.f32 %v3330_v50, 0.0 }
 0x281   :  { %v2005_v19 = vmax.f32 %v3331_v9, 0.0 }
 0x282   :  { %v2073_v33 = vpack.c.bf16 %v2004_v27, %v2001_v1 }
 0x283   :  { %v2074_v53 = vpack.c.bf16 %v2005_v19, %v2002_v45  ;;  %v1562_v49 = vpop.f32.mrb[84].mxu1 }
 0x284   :  { %v3332_v30 = vadd.f32 %v1562_v49, %v4403_v54  ;;  %v1564_v0 = vpop.f32.mrb[85].mxu1 }
 0x285   :  { %v3333_v63 = vadd.f32 %v1564_v0, %v4407_v56  ;;  %v1566_v28 = vpop.f32.mrb[86].mxu1  ;;  %2392 = vmatprep.mubr.bf16.mxu0 %v2074_v53 }
 0x286   :  { %v3334_v13 = vadd.f32 %v1566_v28, %v4403_v54  ;;  %v1568_v2 = vpop.f32.mrb[87].mxu1  ;;  %2393 = vmatmul.mubr.bf16.gmra.mrb[176].mxu0 %v2073_v33  ;;  %v2007_v18 = vmax.f32 %v3332_v30, 0.0 }
 0x287   :  { %v3335_v40 = vadd.f32 %v1568_v2, %v4407_v56  ;;  %v2008_v62 = vmax.f32 %v3333_v63, 0.0 }
 0x288   :  { %v2010_v21 = vmax.f32 %v3334_v13, 0.0 }
 0x289   :  { %v2011_v44 = vmax.f32 %v3335_v40, 0.0 }
 0x28a   :  { %v2076_v60 = vpack.c.bf16 %v2010_v21, %v2007_v18 }
 0x28b   :  { %v2077_v16 = vpack.c.bf16 %v2011_v44, %v2008_v62  ;;  %v1572_v4 = vpop.f32.mrb[88].mxu1 }
 0x28c   :  { %v3336_v5 = vadd.f32 %v1572_v4, %v4403_v54  ;;  %v1574_v7 = vpop.f32.mrb[89].mxu1 }
 0x28d   :  { %v3337_v26 = vadd.f32 %v1574_v7, %v4407_v56  ;;  %v1576_v48 = vpop.f32.mrb[90].mxu1  ;;  %2400 = vmatprep.mubr.bf16.mxu0 %v2077_v16 }
 0x28e   :  { %v3338_v8 = vadd.f32 %v1576_v48, %v4403_v54  ;;  %v1578_v36 = vpop.f32.mrb[91].mxu1  ;;  %2401 = vmatmul.mubr.bf16.gmra.mrb[180].mxu0 %v2076_v60  ;;  %v2013_v20 = vmax.f32 %v3336_v5, 0.0 }
 0x28f   :  { %v3339_v10 = vadd.f32 %v1578_v36, %v4407_v56  ;;  %v2014_v12 = vmax.f32 %v3337_v26, 0.0 }
 0x290   :  { %v2016_v3 = vmax.f32 %v3338_v8, 0.0 }
 0x291   :  { %v2017_v47 = vmax.f32 %v3339_v10, 0.0 }
 0x292   :  { %v2079_v11 = vpack.c.bf16 %v2016_v3, %v2013_v20 }
 0x293   :  { %v2080_v14 = vpack.c.bf16 %v2017_v47, %v2014_v12  ;;  %v1582_v39 = vpop.f32.mrb[92].mxu1 }
 0x294   :  { %v3340_v24 = vadd.f32 %v1582_v39, %v4403_v54  ;;  %v1584_v17 = vpop.f32.mrb[93].mxu1 }
 0x295   :  { %v3341_v38 = vadd.f32 %v1584_v17, %v4407_v56  ;;  %v1586_v32 = vpop.f32.mrb[94].mxu1  ;;  %2408 = vmatprep.mubr.bf16.mxu0 %v2080_v14 }
 0x296   :  { %v3342_v23 = vadd.f32 %v1586_v32, %v4403_v54  ;;  %v1588_v22 = vpop.f32.mrb[95].mxu1  ;;  %2409 = vmatmul.mubr.bf16.gmra.mrb[184].mxu0 %v2079_v11  ;;  %v2019_v15 = vmax.f32 %v3340_v24, 0.0 }
 0x297   :  { %v3343_v51 = vadd.f32 %v1588_v22, %v4407_v56  ;;  %v2020_v31 = vmax.f32 %v3341_v38, 0.0 }
 0x298   :  { %v2022_v6 = vmax.f32 %v3342_v23, 0.0 }
 0x299   :  { %v2023_v29 = vmax.f32 %v3343_v51, 0.0 }
 0x29a   :  { %v2082_v34 = vpack.c.bf16 %v2022_v6, %v2019_v15 }
 0x29b   :  { %v2083_v41 = vpack.c.bf16 %v2023_v29, %v2020_v31  ;;  %v1592_v58 = vpop.f32.mrb[96].mxu1  ;;  %v4540_v29 = vld [vmem:[%s4779_s7] ss:$0 sm:$0xff] }
 0x29c   :  { %v3344_v43 = vadd.f32 %v1592_v58, %v4403_v54  ;;  %v1594_v35 = vpop.f32.mrb[97].mxu1 }
 0x29d   :  { %v3345_v55 = vadd.f32 %v1594_v35, %v4407_v56  ;;  %v1596_v57 = vpop.f32.mrb[98].mxu1  ;;  %2416 = vmatprep.mubr.bf16.mxu0 %v2083_v41 }
 0x29e   :  { %v3346_v52 = vadd.f32 %v1596_v57, %v4403_v54  ;;  %v1598_v37 = vpop.f32.mrb[99].mxu1  ;;  %2417 = vmatmul.mubr.bf16.gmra.mrb[188].mxu0 %v2082_v34  ;;  %v2025_v25 = vmax.f32 %v3344_v43, 0.0 }
 0x29f   :  { %v3347_v42 = vadd.f32 %v1598_v37, %v4407_v56  ;;  %v2026_v61 = vmax.f32 %v3345_v55, 0.0 }
 0x2a0   :  { %v2028_v46 = vmax.f32 %v3346_v52, 0.0 }
 0x2a1   :  { %v2029_v50 = vmax.f32 %v3347_v42, 0.0 }
 0x2a2   :  { %v2085_v59 = vpack.c.bf16 %v2028_v46, %v2025_v25 }
 0x2a3   :  { %v2086_v9 = vpack.c.bf16 %v2029_v50, %v2026_v61  ;;  %v1602_v1 = vpop.f32.mrb[100].mxu1 }
 0x2a4   :  { %v3348_v27 = vadd.f32 %v1602_v1, %v4403_v54  ;;  %v1604_v45 = vpop.f32.mrb[101].mxu1 }
 0x2a5   :  { %v3349_v19 = vadd.f32 %v1604_v45, %v4407_v56  ;;  %v1606_v33 = vpop.f32.mrb[102].mxu1  ;;  %2424 = vmatprep.mubr.bf16.mxu0 %v2086_v9 }
 0x2a6   :  { %v3350_v53 = vadd.f32 %v1606_v33, %v4403_v54  ;;  %v1608_v49 = vpop.f32.mrb[103].mxu1  ;;  %2425 = vmatmul.mubr.bf16.gmra.mrb[192].mxu0 %v2085_v59  ;;  %v2031_v0 = vmax.f32 %v3348_v27, 0.0 }
 0x2a7   :  { %v3351_v30 = vadd.f32 %v1608_v49, %v4407_v56  ;;  %v2032_v28 = vmax.f32 %v3349_v19, 0.0  ;;  %v4549_v49 = vstv %s4780_s0 }
 0x2a8   :  { %v2034_v63 = vmax.f32 %v3350_v53, 0.0 }
 0x2a9   :  { %v2035_v13 = vmax.f32 %v3351_v30, 0.0 }
 0x2aa   :  { %v2088_v2 = vpack.c.bf16 %v2034_v63, %v2031_v0 }
 0x2ab   :  { %v2089_v40 = vpack.c.bf16 %v2035_v13, %v2032_v28  ;;  %v1612_v18 = vpop.f32.mrb[104].mxu1 }
 0x2ac   :  { %v3352_v21 = vadd.f32 %v1612_v18, %v4403_v54  ;;  %v1614_v62 = vpop.f32.mrb[105].mxu1 }
 0x2ad   :  { %v3353_v44 = vadd.f32 %v1614_v62, %v4407_v56  ;;  %v1616_v60 = vpop.f32.mrb[106].mxu1  ;;  %2432 = vmatprep.mubr.bf16.mxu0 %v2089_v40 }
 0x2ae   :  { %v3354_v16 = vadd.f32 %v1616_v60, %v4403_v54  ;;  %v1618_v4 = vpop.f32.mrb[107].mxu1  ;;  %2433 = vmatmul.mubr.bf16.gmra.mrb[196].mxu0 %v2088_v2  ;;  %v2037_v7 = vmax.f32 %v3352_v21, 0.0 }
 0x2af   :  { %v3355_v5 = vadd.f32 %v1618_v4, %v4407_v56  ;;  %v2038_v48 = vmax.f32 %v3353_v44, 0.0 }
 0x2b0   :  { %v2040_v26 = vmax.f32 %v3354_v16, 0.0 }
 0x2b1   :  { %v2041_v8 = vmax.f32 %v3355_v5, 0.0 }
 0x2b2   :  { %v2091_v36 = vpack.c.bf16 %v2040_v26, %v2037_v7 }
 0x2b3   :  { %v2092_v10 = vpack.c.bf16 %v2041_v8, %v2038_v48  ;;  %v1622_v20 = vpop.f32.mrb[108].mxu1 }
 0x2b4   :  { %v3356_v3 = vadd.f32 %v1622_v20, %v4403_v54  ;;  %v1624_v12 = vpop.f32.mrb[109].mxu1 }
 0x2b5   :  { %v3357_v47 = vadd.f32 %v1624_v12, %v4407_v56  ;;  %v1626_v11 = vpop.f32.mrb[110].mxu1  ;;  %2440 = vmatprep.mubr.bf16.mxu0 %v2092_v10 }
 0x2b6   :  { %v3358_v14 = vadd.f32 %v1626_v11, %v4403_v54  ;;  %v1628_v39 = vpop.f32.mrb[111].mxu1  ;;  %2441 = vmatmul.mubr.bf16.gmra.mrb[200].mxu0 %v2091_v36  ;;  %v2043_v17 = vmax.f32 %v3356_v3, 0.0 }
 0x2b7   :  { %v3359_v24 = vadd.f32 %v1628_v39, %v4407_v56  ;;  %v2044_v32 = vmax.f32 %v3357_v47, 0.0 }
 0x2b8   :  { %v2046_v38 = vmax.f32 %v3358_v14, 0.0 }
 0x2b9   :  { %v2047_v23 = vmax.f32 %v3359_v24, 0.0 }
 0x2ba   :  { %v2094_v22 = vpack.c.bf16 %v2046_v38, %v2043_v17 }
 0x2bb   :  { %v2095_v51 = vpack.c.bf16 %v2047_v23, %v2044_v32 }
 0x2bd   :  { %2448 = vmatprep.mubr.bf16.mxu0 %v2095_v51 }
 0x2be   :  { %2449 = vmatmul.mubr.bf16.gmra.mrb[204].mxu0 %v2094_v22 }
 0x319   :  { %v3040_v15 = vpop.f32.mrb[144].mxu0  ;;  %v3262_v6 = vpop.f32.mrb[112].mxu1 }
 0x31a   :  { %v3041_v31 = vpop.f32.mrb[145].mxu0  ;;  %v2491_v54 = vpop.f32.mrb[113].mxu1 }
 0x31b   :  { %v3042_v34 = vadd.f32 %v3041_v31, %v3040_v15  ;;  %v3043_v41 = vpop.f32.mrb[146].mxu0  ;;  %v3263_v56 = vpop.f32.mrb[114].mxu1 }
 0x31c   :  { %v3044_v58 = vpop.f32.mrb[147].mxu0  ;;  %v2494_v43 = vpop.f32.mrb[115].mxu1 }
 0x31d   :  { %v2331_v35 = vadd.f32 %v3042_v34, %v4540_v29  ;;  %v3045_v55 = vadd.f32 %v3044_v58, %v3043_v41 }
 0x31f   :  { %v2492_v57 = vadd.f32 %v2491_v54, %v2331_v35  ;;  %v2334_v52 = vadd.f32 %v3045_v55, %v4540_v29 }
 0x321   :  { %3569 = vtanh.f32 %v2492_v57  ;;  %v2495_v37 = vadd.f32 %v2494_v43, %v2334_v52  ;;  %v3046_v42 = vpop.f32.mrb[148].mxu0  ;;  %v3266_v25 = vpop.f32.mrb[116].mxu1 }
 0x322   :  { %v3047_v46 = vpop.f32.mrb[149].mxu0  ;;  %v2507_v61 = vpop.f32.mrb[117].mxu1 }
 0x323   :  { %3571 = vtanh.f32 %v2495_v37  ;;  %v3048_v50 = vadd.f32 %v3047_v46, %v3046_v42  ;;  %v3049_v59 = vpop.f32.mrb[150].mxu0  ;;  %v3267_v9 = vpop.f32.mrb[118].mxu1 }
 0x324   :  { %v3050_v1 = vpop.f32.mrb[151].mxu0  ;;  %v2510_v27 = vpop.f32.mrb[119].mxu1 }
 0x325   :  { %v2339_v45 = vadd.f32 %v3048_v50, %v4540_v29  ;;  %v3051_v19 = vadd.f32 %v3050_v1, %v3049_v59 }
 0x327   :  { %v2500_v33 = vadd.f32 %v3262_v6, %v2339_v45  ;;  %v2342_v53 = vadd.f32 %v3051_v19, %v4540_v29 }
 0x329   :  { %3573 = vtanh.f32 %v2500_v33  ;;  %v2503_v30 = vadd.f32 %v3263_v56, %v2342_v53  ;;  %v3052_v0 = vpop.f32.mrb[152].mxu0  ;;  %v4551_v63 = vpop.f32.mrb[120].mxu1 }
 0x32a   :  { %v3053_v28 = vpop.f32.mrb[153].mxu0  ;;  %v2523_v13 = vpop.f32.mrb[121].mxu1 }
 0x32b   :  { %v3570_v2 = vpop.eup %3569  ;;  %3575 = vtanh.f32 %v2503_v30  ;;  %v3054_v40 = vadd.f32 %v3053_v28, %v3052_v0  ;;  %v3055_v18 = vpop.f32.mrb[154].mxu0 }
 0x32c   :  { %v4553_v21 = vpop.f32.mrb[122].mxu1  ;;  %v2651_v62 = vmul.f32 %v3570_v2, %v4549_v49  ;;  %v3056_v44 = vpop.f32.mrb[155].mxu0 }
 0x32d   :  { %v2526_v60 = vpop.f32.mrb[123].mxu1  ;;  %v3572_v16 = vpop.eup %3571  ;;  %v2347_v4 = vadd.f32 %v3054_v40, %v4540_v29  ;;  %v3057_v5 = vadd.f32 %v3056_v44, %v3055_v18 }
 0x32e   :  { %2683 = vst [vmem:[%s4781_s8] sm:$0xff] %v2651_v62  ;;  %v2652_v7 = vmul.f32 %v3572_v16, %v4549_v49 }
 0x32f   :  { %v2508_v26 = vadd.f32 %v2507_v61, %v2347_v4  ;;  %v2350_v48 = vadd.f32 %v3057_v5, %v4540_v29 }
 0x330   :  { %2684 = vst [vmem:[%s4781_s8 + $0x8] sm:$0xff] %v2652_v7 }
 0x331   :  { %3577 = vtanh.f32 %v2508_v26  ;;  %v2511_v8 = vadd.f32 %v2510_v27, %v2350_v48  ;;  %v3058_v36 = vpop.f32.mrb[156].mxu0  ;;  %v4565_v10 = vpop.f32.mrb[124].mxu1 }
 0x332   :  { %v3059_v20 = vpop.f32.mrb[157].mxu0  ;;  %v4567_v3 = vpop.f32.mrb[125].mxu1 }
 0x333   :  { %v3574_v12 = vpop.eup %3573  ;;  %3579 = vtanh.f32 %v2511_v8  ;;  %v3060_v47 = vadd.f32 %v3059_v20, %v3058_v36  ;;  %v3061_v11 = vpop.f32.mrb[158].mxu0 }
 0x334   :  { %v4569_v14 = vpop.f32.mrb[126].mxu1  ;;  %v2653_v39 = vmul.f32 %v3574_v12, %v4549_v49  ;;  %v3062_v24 = vpop.f32.mrb[159].mxu0 }
 0x335   :  { %v4572_v17 = vpop.f32.mrb[127].mxu1  ;;  %v3576_v38 = vpop.eup %3575  ;;  %v2355_v32 = vadd.f32 %v3060_v47, %v4540_v29  ;;  %v3063_v23 = vadd.f32 %v3062_v24, %v3061_v11 }
 0x336   :  { %2685 = vst [vmem:[%s4781_s8 + $0x10] sm:$0xff] %v2653_v39  ;;  %v2654_v22 = vmul.f32 %v3576_v38, %v4549_v49 }
 0x337   :  { %v2516_v51 = vadd.f32 %v3266_v25, %v2355_v32  ;;  %v2358_v15 = vadd.f32 %v3063_v23, %v4540_v29 }
 0x338   :  { %2686 = vst [vmem:[%s4781_s8 + $0x18] sm:$0xff] %v2654_v22 }
 0x339   :  { %3581 = vtanh.f32 %v2516_v51  ;;  %v2519_v6 = vadd.f32 %v3267_v9, %v2358_v15  ;;  %v3064_v31 = vpop.f32.mrb[160].mxu0  ;;  %v4583_v54 = vpop.f32.mrb[128].mxu1 }
 0x33a   :  { %v3065_v34 = vpop.f32.mrb[161].mxu0  ;;  %v4585_v41 = vpop.f32.mrb[129].mxu1 }
 0x33b   :  { %v3578_v56 = vpop.eup %3577  ;;  %3583 = vtanh.f32 %v2519_v6  ;;  %v3066_v58 = vadd.f32 %v3065_v34, %v3064_v31  ;;  %v3067_v43 = vpop.f32.mrb[162].mxu0 }
 0x33c   :  { %v4587_v35 = vpop.f32.mrb[130].mxu1  ;;  %v2655_v55 = vmul.f32 %v3578_v56, %v4549_v49  ;;  %v3068_v57 = vpop.f32.mrb[163].mxu0 }
 0x33d   :  { %v4590_v52 = vpop.f32.mrb[131].mxu1  ;;  %v3580_v37 = vpop.eup %3579  ;;  %v2363_v42 = vadd.f32 %v3066_v58, %v4540_v29  ;;  %v3069_v25 = vadd.f32 %v3068_v57, %v3067_v43 }
 0x33e   :  { %2687 = vst [vmem:[%s4781_s8 + $0x20] sm:$0xff] %v2655_v55  ;;  %v2656_v46 = vmul.f32 %v3580_v37, %v4549_v49 }
 0x33f   :  { %v2524_v61 = vadd.f32 %v2523_v13, %v2363_v42  ;;  %v2366_v50 = vadd.f32 %v3069_v25, %v4540_v29 }
 0x340   :  { %2688 = vst [vmem:[%s4781_s8 + $0x28] sm:$0xff] %v2656_v46 }
 0x341   :  { %3585 = vtanh.f32 %v2524_v61  ;;  %v2527_v59 = vadd.f32 %v2526_v60, %v2366_v50  ;;  %v3070_v9 = vpop.f32.mrb[164].mxu0  ;;  %v4601_v1 = vpop.f32.mrb[132].mxu1 }
 0x342   :  { %v3071_v27 = vpop.f32.mrb[165].mxu0  ;;  %v4603_v45 = vpop.f32.mrb[133].mxu1 }
 0x343   :  { %v3582_v19 = vpop.eup %3581  ;;  %3587 = vtanh.f32 %v2527_v59  ;;  %v3072_v33 = vadd.f32 %v3071_v27, %v3070_v9  ;;  %v3073_v53 = vpop.f32.mrb[166].mxu0 }
 0x344   :  { %v4605_v30 = vpop.f32.mrb[134].mxu1  ;;  %v2657_v0 = vmul.f32 %v3582_v19, %v4549_v49  ;;  %v3074_v28 = vpop.f32.mrb[167].mxu0 }
 0x345   :  { %v4608_v13 = vpop.f32.mrb[135].mxu1  ;;  %v3584_v2 = vpop.eup %3583  ;;  %v2371_v40 = vadd.f32 %v3072_v33, %v4540_v29  ;;  %v3075_v18 = vadd.f32 %v3074_v28, %v3073_v53 }
 0x346   :  { %2689 = vst [vmem:[%s4781_s8 + $0x30] sm:$0xff] %v2657_v0  ;;  %v2658_v62 = vmul.f32 %v3584_v2, %v4549_v49 }
 0x347   :  { %v2532_v44 = vadd.f32 %v4551_v63, %v2371_v40  ;;  %v2374_v60 = vadd.f32 %v3075_v18, %v4540_v29 }
 0x348   :  { %2690 = vst [vmem:[%s4781_s8 + $0x38] sm:$0xff] %v2658_v62 }
 0x349   :  { %3589 = vtanh.f32 %v2532_v44  ;;  %v2535_v16 = vadd.f32 %v4553_v21, %v2374_v60  ;;  %v3076_v4 = vpop.f32.mrb[168].mxu0  ;;  %v4621_v5 = vpop.f32.mrb[136].mxu1 }
 0x34a   :  { %v3077_v7 = vpop.f32.mrb[169].mxu0  ;;  %v4623_v26 = vpop.f32.mrb[137].mxu1 }
 0x34b   :  { %v3586_v48 = vpop.eup %3585  ;;  %3591 = vtanh.f32 %v2535_v16  ;;  %v3078_v8 = vadd.f32 %v3077_v7, %v3076_v4  ;;  %v3079_v36 = vpop.f32.mrb[170].mxu0 }
 0x34c   :  { %v4625_v63 = vpop.f32.mrb[138].mxu1  ;;  %v2659_v20 = vmul.f32 %v3586_v48, %v4549_v49  ;;  %v3080_v12 = vpop.f32.mrb[171].mxu0 }
 0x34d   :  { %v4628_v47 = vpop.f32.mrb[139].mxu1  ;;  %v3588_v11 = vpop.eup %3587  ;;  %v2379_v21 = vadd.f32 %v3078_v8, %v4540_v29  ;;  %v3081_v39 = vadd.f32 %v3080_v12, %v3079_v36 }
 0x34e   :  { %2691 = vst [vmem:[%s4781_s8 + $0x40] sm:$0xff] %v2659_v20  ;;  %v2660_v24 = vmul.f32 %v3588_v11, %v4549_v49 }
 0x34f   :  { %v2540_v38 = vadd.f32 %v4567_v3, %v2379_v21  ;;  %v2382_v32 = vadd.f32 %v3081_v39, %v4540_v29 }
 0x350   :  { %2692 = vst [vmem:[%s4781_s8 + $0x48] sm:$0xff] %v2660_v24 }
 0x351   :  { %3593 = vtanh.f32 %v2540_v38  ;;  %v2543_v23 = vadd.f32 %v4572_v17, %v2382_v32  ;;  %v3082_v22 = vpop.f32.mrb[172].mxu0  ;;  %v4641_v51 = vpop.f32.mrb[140].mxu1 }
 0x352   :  { %v3083_v15 = vpop.f32.mrb[173].mxu0  ;;  %v4643_v6 = vpop.f32.mrb[141].mxu1 }
 0x353   :  { %v3590_v31 = vpop.eup %3589  ;;  %3595 = vtanh.f32 %v2543_v23  ;;  %v3084_v34 = vadd.f32 %v3083_v15, %v3082_v22  ;;  %v3085_v56 = vpop.f32.mrb[174].mxu0 }
 0x354   :  { %v4645_v3 = vpop.f32.mrb[142].mxu1  ;;  %v2661_v58 = vmul.f32 %v3590_v31, %v4549_v49  ;;  %v3086_v43 = vpop.f32.mrb[175].mxu0 }
 0x355   :  { %v4648_v55 = vpop.f32.mrb[143].mxu1  ;;  %v3592_v57 = vpop.eup %3591  ;;  %v2387_v17 = vadd.f32 %v3084_v34, %v4540_v29  ;;  %v3087_v37 = vadd.f32 %v3086_v43, %v3085_v56 }
 0x356   :  { %2693 = vst [vmem:[%s4781_s8 + $0x50] sm:$0xff] %v2661_v58  ;;  %v2662_v42 = vmul.f32 %v3592_v57, %v4549_v49 }
 0x357   :  { %v2548_v25 = vadd.f32 %v4565_v10, %v2387_v17  ;;  %v2390_v46 = vadd.f32 %v3087_v37, %v4540_v29 }
 0x358   :  { %2694 = vst [vmem:[%s4781_s8 + $0x58] sm:$0xff] %v2662_v42 }
 0x359   :  { %3597 = vtanh.f32 %v2548_v25  ;;  %v2551_v61 = vadd.f32 %v4569_v14, %v2390_v46  ;;  %v3088_v50 = vpop.f32.mrb[176].mxu0 }
 0x35a   :  { %v3089_v59 = vpop.f32.mrb[177].mxu0 }
 0x35b   :  { %v3594_v9 = vpop.eup %3593  ;;  %3599 = vtanh.f32 %v2551_v61  ;;  %v3090_v27 = vadd.f32 %v3089_v59, %v3088_v50  ;;  %v3091_v19 = vpop.f32.mrb[178].mxu0 }
 0x35c   :  { %v2663_v33 = vmul.f32 %v3594_v9, %v4549_v49  ;;  %v3092_v53 = vpop.f32.mrb[179].mxu0 }
 0x35d   :  { %v3596_v0 = vpop.eup %3595  ;;  %v2395_v10 = vadd.f32 %v3090_v27, %v4540_v29  ;;  %v3093_v28 = vadd.f32 %v3092_v53, %v3091_v19 }
 0x35e   :  { %2695 = vst [vmem:[%s4781_s8 + $0x60] sm:$0xff] %v2663_v33  ;;  %v2664_v2 = vmul.f32 %v3596_v0, %v4549_v49 }
 0x35f   :  { %v2556_v14 = vadd.f32 %v4585_v41, %v2395_v10  ;;  %v2398_v40 = vadd.f32 %v3093_v28, %v4540_v29 }
 0x360   :  { %2696 = vst [vmem:[%s4781_s8 + $0x68] sm:$0xff] %v2664_v2 }
 0x361   :  { %3601 = vtanh.f32 %v2556_v14  ;;  %v2559_v18 = vadd.f32 %v4590_v52, %v2398_v40  ;;  %v3094_v62 = vpop.f32.mrb[180].mxu0 }
 0x362   :  { %v3095_v44 = vpop.f32.mrb[181].mxu0 }
 0x363   :  { %v3598_v60 = vpop.eup %3597  ;;  %3603 = vtanh.f32 %v2559_v18  ;;  %v3096_v16 = vadd.f32 %v3095_v44, %v3094_v62  ;;  %v3097_v4 = vpop.f32.mrb[182].mxu0 }
 0x364   :  { %v2665_v7 = vmul.f32 %v3598_v60, %v4549_v49  ;;  %v3098_v48 = vpop.f32.mrb[183].mxu0 }
 0x365   :  { %v3600_v8 = vpop.eup %3599  ;;  %v2403_v41 = vadd.f32 %v3096_v16, %v4540_v29  ;;  %v3099_v36 = vadd.f32 %v3098_v48, %v3097_v4 }
 0x366   :  { %2697 = vst [vmem:[%s4781_s8 + $0x70] sm:$0xff] %v2665_v7  ;;  %v2666_v20 = vmul.f32 %v3600_v8, %v4549_v49 }
 0x367   :  { %v2564_v52 = vadd.f32 %v4583_v54, %v2403_v41  ;;  %v2406_v12 = vadd.f32 %v3099_v36, %v4540_v29 }
 0x368   :  { %2698 = vst [vmem:[%s4781_s8 + $0x78] sm:$0xff] %v2666_v20 }
 0x369   :  { %3605 = vtanh.f32 %v2564_v52  ;;  %v2567_v11 = vadd.f32 %v4587_v35, %v2406_v12  ;;  %v3100_v21 = vpop.f32.mrb[184].mxu0 }
 0x36a   :  { %v3101_v39 = vpop.f32.mrb[185].mxu0 }
 0x36b   :  { %v3602_v24 = vpop.eup %3601  ;;  %3607 = vtanh.f32 %v2567_v11  ;;  %v3102_v38 = vadd.f32 %v3101_v39, %v3100_v21  ;;  %v3103_v32 = vpop.f32.mrb[186].mxu0 }
 0x36c   :  { %v2667_v23 = vmul.f32 %v3602_v24, %v4549_v49  ;;  %v3104_v22 = vpop.f32.mrb[187].mxu0 }
 0x36d   :  { %v3604_v15 = vpop.eup %3603  ;;  %v2411_v54 = vadd.f32 %v3102_v38, %v4540_v29  ;;  %v3105_v31 = vadd.f32 %v3104_v22, %v3103_v32 }
 0x36e   :  { %2699 = vst [vmem:[%s4781_s8 + $0x80] sm:$0xff] %v2667_v23  ;;  %v2668_v34 = vmul.f32 %v3604_v15, %v4549_v49 }
 0x36f   :  { %v2572_v35 = vadd.f32 %v4603_v45, %v2411_v54  ;;  %v2414_v56 = vadd.f32 %v3105_v31, %v4540_v29 }
 0x370   :  { %2700 = vst [vmem:[%s4781_s8 + $0x88] sm:$0xff] %v2668_v34 }
 0x371   :  { %3609 = vtanh.f32 %v2572_v35  ;;  %v2575_v58 = vadd.f32 %v4608_v13, %v2414_v56  ;;  %v3106_v43 = vpop.f32.mrb[188].mxu0 }
 0x372   :  { %v3107_v57 = vpop.f32.mrb[189].mxu0 }
 0x373   :  { %v3606_v17 = vpop.eup %3605  ;;  %3611 = vtanh.f32 %v2575_v58  ;;  %v3108_v37 = vadd.f32 %v3107_v57, %v3106_v43  ;;  %v3109_v42 = vpop.f32.mrb[190].mxu0 }
 0x374   :  { %v2669_v25 = vmul.f32 %v3606_v17, %v4549_v49  ;;  %v3110_v46 = vpop.f32.mrb[191].mxu0 }
 0x375   :  { %v3608_v61 = vpop.eup %3607  ;;  %v2419_v45 = vadd.f32 %v3108_v37, %v4540_v29  ;;  %v3111_v50 = vadd.f32 %v3110_v46, %v3109_v42 }
 0x376   :  { %2701 = vst [vmem:[%s4781_s8 + $0x90] sm:$0xff] %v2669_v25  ;;  %v2670_v59 = vmul.f32 %v3608_v61, %v4549_v49 }
 0x377   :  { %v2580_v13 = vadd.f32 %v4601_v1, %v2419_v45  ;;  %v2422_v9 = vadd.f32 %v3111_v50, %v4540_v29 }
 0x378   :  { %2702 = vst [vmem:[%s4781_s8 + $0x98] sm:$0xff] %v2670_v59 }
 0x379   :  { %3613 = vtanh.f32 %v2580_v13  ;;  %v2583_v27 = vadd.f32 %v4605_v30, %v2422_v9  ;;  %v3112_v19 = vpop.f32.mrb[192].mxu0 }
 0x37a   :  { %v3113_v33 = vpop.f32.mrb[193].mxu0 }
 0x37b   :  { %v3610_v53 = vpop.eup %3609  ;;  %3615 = vtanh.f32 %v2583_v27  ;;  %v3114_v0 = vadd.f32 %v3113_v33, %v3112_v19  ;;  %v3115_v10 = vpop.f32.mrb[194].mxu0 }
 0x37c   :  { %v2671_v28 = vmul.f32 %v3610_v53, %v4549_v49  ;;  %v3116_v2 = vpop.f32.mrb[195].mxu0 }
 0x37d   :  { %v3612_v14 = vpop.eup %3611  ;;  %v2427_v1 = vadd.f32 %v3114_v0, %v4540_v29  ;;  %v3117_v40 = vadd.f32 %v3116_v2, %v3115_v10 }
 0x37e   :  { %2703 = vst [vmem:[%s4781_s8 + $0xa0] sm:$0xff] %v2671_v28  ;;  %v2672_v18 = vmul.f32 %v3612_v14, %v4549_v49 }
 0x37f   :  { %v2588_v30 = vadd.f32 %v4623_v26, %v2427_v1  ;;  %v2430_v62 = vadd.f32 %v3117_v40, %v4540_v29 }
 0x380   :  { %2704 = vst [vmem:[%s4781_s8 + $0xa8] sm:$0xff] %v2672_v18 }
 0x381   :  { %3617 = vtanh.f32 %v2588_v30  ;;  %v2591_v44 = vadd.f32 %v4628_v47, %v2430_v62  ;;  %v3118_v60 = vpop.f32.mrb[196].mxu0 }
 0x382   :  { %v3119_v16 = vpop.f32.mrb[197].mxu0 }
 0x383   :  { %v3614_v4 = vpop.eup %3613  ;;  %3619 = vtanh.f32 %v2591_v44  ;;  %v3120_v7 = vadd.f32 %v3119_v16, %v3118_v60  ;;  %v3121_v48 = vpop.f32.mrb[198].mxu0 }
 0x384   :  { %v2673_v8 = vmul.f32 %v3614_v4, %v4549_v49  ;;  %v3122_v41 = vpop.f32.mrb[199].mxu0 }
 0x385   :  { %v3616_v36 = vpop.eup %3615  ;;  %v2435_v26 = vadd.f32 %v3120_v7, %v4540_v29  ;;  %v3123_v20 = vadd.f32 %v3122_v41, %v3121_v48 }
 0x386   :  { %2705 = vst [vmem:[%s4781_s8 + $0xb0] sm:$0xff] %v2673_v8  ;;  %v2674_v52 = vmul.f32 %v3616_v36, %v4549_v49 }
 0x387   :  { %v2596_v47 = vadd.f32 %v4621_v5, %v2435_v26  ;;  %v2438_v12 = vadd.f32 %v3123_v20, %v4540_v29 }
 0x388   :  { %2706 = vst [vmem:[%s4781_s8 + $0xb8] sm:$0xff] %v2674_v52 }
 0x389   :  { %3621 = vtanh.f32 %v2596_v47  ;;  %v2599_v11 = vadd.f32 %v4625_v63, %v2438_v12  ;;  %v3124_v21 = vpop.f32.mrb[200].mxu0 }
 0x38a   :  { %v3125_v39 = vpop.f32.mrb[201].mxu0 }
 0x38b   :  { %v3618_v24 = vpop.eup %3617  ;;  %3623 = vtanh.f32 %v2599_v11  ;;  %v3126_v38 = vadd.f32 %v3125_v39, %v3124_v21  ;;  %v3127_v32 = vpop.f32.mrb[202].mxu0 }
 0x38c   :  { %v2675_v23 = vmul.f32 %v3618_v24, %v4549_v49  ;;  %v3128_v22 = vpop.f32.mrb[203].mxu0 }
 0x38d   :  { %v3620_v15 = vpop.eup %3619  ;;  %v2443_v5 = vadd.f32 %v3126_v38, %v4540_v29  ;;  %v3129_v54 = vadd.f32 %v3128_v22, %v3127_v32 }
 0x38e   :  { %2707 = vst [vmem:[%s4781_s8 + $0xc0] sm:$0xff] %v2675_v23  ;;  %v2676_v31 = vmul.f32 %v3620_v15, %v4549_v49 }
 0x38f   :  { %v2604_v63 = vadd.f32 %v4643_v6, %v2443_v5  ;;  %v2446_v34 = vadd.f32 %v3129_v54, %v4540_v29 }
 0x390   :  { %2708 = vst [vmem:[%s4781_s8 + $0xc8] sm:$0xff] %v2676_v31 }
 0x391   :  { %3625 = vtanh.f32 %v2604_v63  ;;  %v2607_v35 = vadd.f32 %v4648_v55, %v2446_v34  ;;  %v3130_v56 = vpop.f32.mrb[204].mxu0 }
 0x392   :  { %v3131_v58 = vpop.f32.mrb[205].mxu0 }
 0x393   :  { %v3622_v43 = vpop.eup %3621  ;;  %3627 = vtanh.f32 %v2607_v35  ;;  %v3132_v57 = vadd.f32 %v3131_v58, %v3130_v56  ;;  %v3133_v17 = vpop.f32.mrb[206].mxu0 }
 0x394   :  { %v2677_v37 = vmul.f32 %v3622_v43, %v4549_v49  ;;  %v3134_v42 = vpop.f32.mrb[207].mxu0 }
 0x395   :  { %v3624_v25 = vpop.eup %3623  ;;  %v2451_v6 = vadd.f32 %v3132_v57, %v4540_v29  ;;  %v3135_v46 = vadd.f32 %v3134_v42, %v3133_v17 }
 0x396   :  { %2709 = vst [vmem:[%s4781_s8 + $0xd0] sm:$0xff] %v2677_v37  ;;  %v2678_v61 = vmul.f32 %v3624_v25, %v4549_v49 }
 0x397   :  { %v2612_v55 = vadd.f32 %v4641_v51, %v2451_v6  ;;  %v2454_v45 = vadd.f32 %v3135_v46, %v4540_v29 }
 0x398   :  { %2710 = vst [vmem:[%s4781_s8 + $0xd8] sm:$0xff] %v2678_v61 }
 0x399   :  { %3629 = vtanh.f32 %v2612_v55  ;;  %v2615_v50 = vadd.f32 %v4645_v3, %v2454_v45 }
 0x39b   :  { %v3626_v59 = vpop.eup %3625  ;;  %3631 = vtanh.f32 %v2615_v50 }
 0x39c   :  { %v2679_v13 = vmul.f32 %v3626_v59, %v4549_v49 }
 0x39d   :  { %v3628_v9 = vpop.eup %3627 }
 0x39e   :  { %2711 = vst [vmem:[%s4781_s8 + $0xe0] sm:$0xff] %v2679_v13  ;;  %v2680_v51 = vmul.f32 %v3628_v9, %v4549_v49 }
 0x3a0   :  { %2712 = vst [vmem:[%s4781_s8 + $0xe8] sm:$0xff] %v2680_v51 }
 0x3a3   :  { %v3630_v29 = vpop.eup %3629 }
 0x3a4   :  { %v2681_v27 = vmul.f32 %v3630_v29, %v4549_v49 }
 0x3a5   :  { %v3632_v19 = vpop.eup %3631 }
 0x3a6   :  { %2713 = vst [vmem:[%s4781_s8 + $0xf0] sm:$0xff] %v2681_v27  ;;  %v2682_v3 = vmul.f32 %v3632_v19, %v4549_v49 }
 0x3a8   :  { %2714 = vst [vmem:[%s4781_s8 + $0xf8] sm:$0xff] %v2682_v3 }

</bundles_post_ra>
